<compile_context>
chip_gen: v6e
topology: v6e:2x2x1
jax: 0.10.0
libtpu: 0.0.40
codegen_flags: <defaults>
</compile_context>

<pallas_src>
import jax
import jax.numpy as jnp
from jax.experimental import pallas as pl
from jax.experimental.pallas import tpu as pltpu

_LANE = 128
_SMALL_INPUT_BYTES = 1 << 20  # below ~1 MiB a Pallas launch is pure overhead


def _round_up(x, m):
    return ((x + m - 1) // m) * m


def _dsp_kernel(moving_ref, fixed_ref, dsp_ref):
    # TODO(synk): ModelWrapper.forward is abstract (raises NotImplementedError);
    # this kernel realizes the interface with the elementwise displacement
    # proxy dsp = fixed - moving. A concrete registration model would go here.
    dsp_ref[...] = fixed_ref[...] - moving_ref[...]


def _sublane_multiple(itemsize):
    # Sub-32-bit dtypes pack along sublanes: f32 -> 8, bf16/f16 -> 16, int8/fp8 -> 32.
    return max(8, 32 // max(1, itemsize))


def _device_kind():
    try:
        return jax.devices()[0].device_kind.lower()
    except Exception:
        return ""


def _tile_bytes_per_array(kind):
    # Per-step footprint is 3 arrays x 2 pipeline buffers x tile:
    #   2 MiB -> 12 MiB (safe under v5e's 16 MiB scoped-VMEM default)
    #   4 MiB -> 24 MiB (fits v6e / v7x 32 MiB scoped-VMEM default)
    if ("v6" in kind) or ("v7" in kind):
        return 4 << 20
    return 2 << 20


def _pick_cols(shape, total, sublane):
    """Pick a lane-dense column count such that reshaping the contiguous
    input to (total // cols, cols) is a free, copy-less reshape.
    Prefer natural trailing-dim groupings (W, H*W, ...), then generic
    128-multiple divisors. Returns None if no such layout exists."""
    naturals = []
    prod = 1
    for d in reversed(shape):
        prod *= d
        if prod % _LANE == 0:
            naturals.append(prod)
    generic = [c for c in (1024, 512, 256, 2048, 4096, 128) if total % c == 0]
    for c in naturals + generic:
        if total % c != 0:
            continue
        rows = total // c
        if rows >= sublane:  # enough rows to tile / pipeline
            return c
    return None


def model_wrapper_forward(moving_image, fixed_image):
    """moving_image, fixed_image: [N, C, H, W] -> dsp: [N, C, H, W]."""
    assert moving_image.shape == fixed_image.shape
    assert moving_image.dtype == fixed_image.dtype
    shape = moving_image.shape
    dtype = moving_image.dtype
    total = int(moving_image.size)
    itemsize = jnp.dtype(dtype).itemsize
    sublane = _sublane_multiple(itemsize)

    # Tiny inputs: launch + per-grid-step overhead dominates; fused XLA
    # elementwise subtract is already at roofline.
    if total * itemsize < _SMALL_INPUT_BYTES:
        return fixed_image - moving_image

    cols = _pick_cols(shape, total, sublane)
    if cols is None:
        # No copy-free lane-dense layout exists. Any repack/pad would cost a
        # full extra HBM pass on a bandwidth-bound op, so just let XLA fuse it.
        return fixed_image - moving_image

    rows = total // cols
    kind = _device_kind()
    ideal_rows = max(sublane, _tile_bytes_per_array(kind) // (cols * itemsize))

    nsteps = pl.cdiv(rows, ideal_rows)
    if nsteps <= 1:
        tile_rows = rows  # single block equal to the full array
    else:
        # Balance the grid (even steps when possible); the ragged last block,
        # if any, is masked by Pallas — block_shape only needs (sublane, 128)
        # divisibility, not array divisibility.
        tile_rows = min(_round_up(pl.cdiv(rows, nsteps), sublane), rows)
    grid_n = pl.cdiv(rows, tile_rows)

    # Contiguous row-major reshape: pure metadata change, no data movement.
    m2 = moving_image.reshape(rows, cols)
    f2 = fixed_image.reshape(rows, cols)

    block = pl.BlockSpec((tile_rows, cols), lambda i: (i, 0))

    # Only CORE_PARALLEL actually shards grid steps across v7x's two
    # TensorCores; plain "parallel" is neutral on single-TC v5e/v6e.
    semantics = ("parallel",)
    if "v7" in kind and grid_n >= 2 and grid_n % 2 == 0 and hasattr(pltpu, "CORE_PARALLEL"):
        semantics = (pltpu.CORE_PARALLEL,)

    out2 = pl.pallas_call(
        _dsp_kernel,
        out_shape=jax.ShapeDtypeStruct((rows, cols), dtype),
        grid_spec=pltpu.PrefetchScalarGridSpec(
            num_scalar_prefetch=0,
            grid=(grid_n,),
            in_specs=[block, block],
            out_specs=pl.BlockSpec((tile_rows, cols), lambda i: (i, 0)),
        ),
        compiler_params=pltpu.CompilerParams(dimension_semantics=semantics),
        cost_estimate=pl.CostEstimate(
            flops=total,
            transcendentals=0,
            bytes_accessed=3 * total * itemsize,
        ),
    )(m2, f2)

    return out2.reshape(shape)


if __name__ == "__main__":
    key = jax.random.PRNGKey(0)
    k1, k2, k3, k4, k5, k6 = jax.random.split(key, 6)

    # Case 1: tiny registration-style input -> small-input fast path.
    small_shape = (2, 4, 16, 16)
    m_small = jax.random.normal(k1, small_shape, dtype=jnp.float32)
    f_small = jax.random.normal(k2, small_shape, dtype=jnp.float32)
    dsp_small = model_wrapper_forward(m_small, f_small)
    jax.block_until_ready(dsp_small)
    assert dsp_small.shape == small_shape
    assert jnp.allclose(dsp_small, f_small - m_small, atol=1e-6)

    # Case 2: modest f32 input -> Pallas path, natural W=384 (3x128) lane
    # layout, copy-free reshape, balanced multi-step grid.
    big_shape = (2, 4, 384, 384)  # 4.5 MiB f32 per image
    m_big = jax.random.normal(k3, big_shape, dtype=jnp.float32)
    f_big = jax.random.normal(k4, big_shape, dtype=jnp.float32)
    dsp_big = model_wrapper_forward(m_big, f_big)
    jax.block_until_ready(dsp_big)
    assert dsp_big.shape == big_shape
    assert jnp.allclose(dsp_big, f_big - m_big, atol=1e-6)

    # Case 3: bf16 input -> exercises dtype-aware sublane rounding (16).
    m_bf = jax.random.normal(k5, big_shape, dtype=jnp.float32).astype(jnp.bfloat16)
    f_bf = jax.random.normal(k6, big_shape, dtype=jnp.float32).astype(jnp.bfloat16)
    dsp_bf = model_wrapper_forward(m_bf, f_bf)
    jax.block_until_ready(dsp_bf)
    assert dsp_bf.shape == big_shape
    assert jnp.allclose(dsp_bf.astype(jnp.float32),
                        (f_bf - m_bf).astype(jnp.float32), atol=1e-2)

    print("KERNEL_OK")
</pallas_src>

<mosaic_0001>
module attributes {stable_mosaic.version = 11 : i64} {
  func.func @_dsp_kernel(%arg0: i32, %arg1: memref<1024x384xf32, #tpu.memory_space<vmem>>, %arg2: memref<1024x384xf32, #tpu.memory_space<vmem>>, %arg3: memref<1024x384xf32, #tpu.memory_space<vmem>>) attributes {dimension_semantics = [#tpu.dimension_semantics<parallel>], iteration_bounds = array<i64: 3>, scalar_prefetch = 0 : i64, scratch_operands = 0 : i64, tpu.core_type = #tpu.core_type<tc>, window_params = [{transform_indices = @transform_0, window_bounds = array<i64: 1024, 384>}, {transform_indices = @transform_1, window_bounds = array<i64: 1024, 384>}, {transform_indices = @transform_2, window_bounds = array<i64: 1024, 384>}]} {
    %c0 = arith.constant 0 : index
    %c0_0 = arith.constant 0 : index
    %0 = vector.load %arg2[%c0, %c0_0] : memref<1024x384xf32, #tpu.memory_space<vmem>>, vector<1024x384xf32>
    %c0_1 = arith.constant 0 : index
    %c0_2 = arith.constant 0 : index
    %1 = vector.load %arg1[%c0_1, %c0_2] : memref<1024x384xf32, #tpu.memory_space<vmem>>, vector<1024x384xf32>
    %2 = arith.subf %0, %1 : vector<1024x384xf32>
    %c0_3 = arith.constant 0 : index
    %c0_4 = arith.constant 0 : index
    %3 = vector.load %arg3[%c0_3, %c0_4] : memref<1024x384xf32, #tpu.memory_space<vmem>>, vector<1024x384xf32>
    tpu.vector_store %arg3[%c0_3, %c0_4], %2 {strides = array<i32>} : memref<1024x384xf32, #tpu.memory_space<vmem>>, vector<1024x384xf32>,
    return
  }
  func.func @transform_0(%arg0: i32) -> (i32, i32) {
    %c0_i32 = arith.constant 0 : i32
    %c0_i32_0 = arith.constant 0 : i32
    return %arg0, %c0_i32 : i32, i32
  }
  func.func @transform_1(%arg0: i32) -> (i32, i32) {
    %c0_i32 = arith.constant 0 : i32
    %c0_i32_0 = arith.constant 0 : i32
    return %arg0, %c0_i32 : i32, i32
  }
  func.func @transform_2(%arg0: i32) -> (i32, i32) {
    %c0_i32 = arith.constant 0 : i32
    %c0_i32_0 = arith.constant 0 : i32
    return %arg0, %c0_i32 : i32, i32
  }
}

</mosaic_0001>

<bundles_post_ra>
// kernel: tpu_custom_call.1
= control target key start
LH: loop header
LB: loop body
LE: loop exit
PB: predicated region body
PF: predicated region fallthrough
CT: control target
= control target key end

     0   :  { %7 = vsyncpa [#allocation3], 0  ;;  %s3447_s0 = inlined_call_operand.hbm [shape: f32[3072,384], index: 0, kind: input, shape index: {}]   ;;  %s3448_s1 = inlined_call_operand.hbm [shape: f32[3072,384], index: 1, kind: input, shape index: {}]   ;;  %s3449_s2 = inlined_call_operand.hbm [shape: f32[3072,384], index: 2, kind: output, shape index: {}]  }
   0x1   :  { %9 = vsyncpa [#allocation3 + $0x1], 0 }
   0x2   :  { %10 = vsyncpa [#allocation6], 0 }
   0x3   :  { %12 = vsyncpa [#allocation6 + $0x1], 0 }
   0x4   :  { %13 = vsyncpa [#allocation4], 0 }
   0x5   :  { %15 = vsyncpa [#allocation4 + $0x1], 0  ;;  %s2078_s9 = smov 0   ;;  %s2080_s10 = smov 0  }
   0x6   :  { %s2082_s11 = smov 0   ;;  %s2084_s12 = smov 0  }
   0x7 LB: > { %s2099_s13 = sadd.s32 4294967295, %s2054_s12   ;;  %s1854_s14 = sadd.s32 4294967294, %s2054_s12   ;;  %s2054_s12 = sphi %s2084_s12, %s3463_s12   ;;  %s2050_s11 = sphi %s2082_s11, %s3462_s11   ;;  %s2046_s10 = sphi %s2080_s10, %s3461_s10   ;;  %s2042_s9 = sphi %s2078_s9, %s3460_s9  }
   0x8   : > { %s2103_s15 = sadd.s32 1, %s2054_s12   ;;  %s28_s16 = sadd.s32 1, %s2050_s11 }
   0x9   : > { %s25_s17 = ssub.s32 %s2054_s12, %s2103_s15  ;;  %p35_p0 = scmp.ne.s32.totalorder %s2050_s11, %s2046_s10 }
   0xa   : > { %p26_p1 = scmp.eq.s32.totalorder %s25_s17, 0  ;;  %p36_p2 = scmp.eq.s32.totalorder %s2054_s12, 0 }
   0xb   : > { %p41_p3 = scmp.ne.s32.totalorder %s2046_s10, %s2042_s9  ;;  %p42_p4 = scmp.eq.s32.totalorder %s2099_s13, 0 }
   0xc   : > { %s2115_s18 = scalar_select %p26_p1, %s2050_s11, %s28_s16  }
   0xd   : > { %p37_p5 = por %p36_p2, %p35_p0  ;;  %p2117_p6 = por %p42_p4, %p41_p3 }
   0xe   : > { %p91_p7 = scmp.eq.s32.totalorder %s2099_s13, 2  ;;  %p97_p8 = scmp.eq.s32.totalorder %s1854_s14, 2 }
   0xf   : > { %s3452_s19 = scalar_select %p2117_p6, 1, 0 }
  0x10   : > { %p1892_p9 = scmp.lt.s32.totalorder %s2054_s12, 3  ;;  %p2123_p10 = por %p91_p7, %p35_p0 }
  0x11   : > { %p2127_p11 = por %p97_p8, %p41_p3  ;;  %s2132_s22 = sand.u32 1, %s2050_s11  }
  0x12   : > { %s3453_s20 = scalar_select %p2123_p10, 1, 0 }
  0x13   : > { %s3454_s21 = scalar_select %p2127_p11, 1, 0 }
  0x14   : > { %s1870_s23 = smul.u32 49152, %s2054_s12  ;;  %p2143_p12 = pnand %p1892_p9, %p37_p5 }
  0x15   : > { %s1869_s24 = smul.u32 3072, %s2132_s22  ;;  %s118_s3 = scalar_lea.sflag [#allocation3], %s2132_s22 }
  0x16   : > { %s2141_s27 = scalar_lea.hbm %s3447_s0, %s1870_s23  ;;  %p1932_p0 = pneg %p2143_p12 }
  0x17   : > { %s121_s29 = scalar_lea.vmem [#allocation2], %s1869_s24  ;;  %s1930_s4 = scalar_lea.hbm %s2141_s27, 49152 }
  0x18   : > { %s129_s30 = sshll.u32 %s121_s29, 4  ;;  %p1931_p13 = scmp.ne.s32.totalorder %s2141_s27, %s1930_s4  ;;  %s2149_s30 = int_to_ptr.vmem [resolvable:$true] %s129_s30 }
  0x19   : > { %s1935_s7 = scalar_lea.hbm %s3447_s0, 147456  ;;  %p1936_p3 = scmp.lt.s32.totalorder %s2141_s27, %s3447_s0 }
  0x1a   : > { %p1933_p1 = pnand %p1932_p0, %p1931_p13  ;;  %p1937_p4 = scmp.lt.s32.totalorder %s1935_s7, %s1930_s4 }
  0x1c   : > { %p1934_p2 = pneg %p1933_p1  ;;  %p1938_p5 = por %p1937_p4, %p1936_p3 }
  0x1e   : > { %p1939_p7 = pnand %p1938_p5, %p1934_p2 }
  0x20   : > { %1942 = shalt.err (!%p1939_p7)
}
  0x21   : > { %s1943_s16 = scalar_lea.vmem %s2149_s30, 49152  ;;  %s2056_s17 = smov [#allocation2]  }
  0x22   : > { %p1944_p8 = scmp.ne.s32.totalorder %s2149_s30, %s1943_s16  ;;  %s1948_s25 = sshll.u32 %s2056_s17, 4  ;;  %s1949_s25 = int_to_ptr.vmem [resolvable:$false] %s1948_s25 }
  0x23   : > { %s1950_s26 = scalar_lea.vmem %s1949_s25, 98304  ;;  %p1951_p1 = scmp.lt.s32.totalorder %s2149_s30, %s1949_s25 }
  0x24   : > { %p1946_p9 = pnand %p1944_p8, %p1932_p0  ;;  %p1952_p11 = scmp.lt.s32.totalorder %s1950_s26, %s1943_s16 }
  0x26   : > { %p1947_p13 = pneg %p1946_p9  ;;  %p1953_p10 = por %p1952_p11, %p1951_p1 }
  0x28   : > { %p1954_p3 = pnand %p1953_p10, %p1947_p13 }
  0x2a   : > { %1957 = shalt.err (!%p1954_p3)
}
  0x2b   : > { %s2057_s29 = smov 384   ;;  %s2058_s4 = smov 24  }
  0x2c   : > { %1884 = dma.hbm_to_vmem [thread:$0]  (!%p2143_p12), %s2141_s27, 49152, %s2149_s30, %s118_s3, %s2057_s29, %s2057_s29, %s2058_s4  }
  0x2d   : > { %p1863_p10 = scmp.ge.s32.totalorder %s2054_s12, 1  ;;  %p159_p11 = scmp.lt.s32.totalorder %s2054_s12, 4 }
  0x2e   : > { %s2192_s8 = scalar_lea.hbm %s3448_s1, %s1870_s23  ;;  %s143_s14 = scalar_lea.vmem [#allocation5], %s1869_s24 }
  0x2f   : > { %p2183_p2 = pnand %p1863_p10, %p159_p11  ;;  %s151_s16 = sshll.u32 %s143_s14, 4  ;;  %s2196_s16 = int_to_ptr.vmem [resolvable:$true] %s151_s16 }
  0x30   : > { %s140_s27 = scalar_lea.sflag [#allocation6], %s2132_s22  ;;  %s1958_s30 = scalar_lea.hbm %s2192_s8, 49152 }
  0x31   : > { %p1959_p4 = scmp.ne.s32.totalorder %s2192_s8, %s1958_s30  ;;  %s1963_s23 = scalar_lea.hbm %s3448_s1, 147456 }
  0x32   : > { %p1964_p8 = scmp.lt.s32.totalorder %s2192_s8, %s3448_s1  ;;  %p1965_p9 = scmp.lt.s32.totalorder %s1963_s23, %s1958_s30 }
  0x33   : > { %p1961_p5 = pnand %p1959_p4, %p1932_p0 }
  0x34   : > { %p1966_p13 = por %p1965_p9, %p1964_p8 }
  0x35   : > { %p1962_p7 = pneg %p1961_p5 }
  0x37   : > { %p1967_p1 = pnand %p1966_p13, %p1962_p7 }
  0x39   : > { %1970 = shalt.err (!%p1967_p1)
}
  0x3a   : > { %s1971_s22 = scalar_lea.vmem %s2196_s16, 49152  ;;  %s2059_s24 = smov [#allocation5]  }
  0x3b   : > { %p1972_p3 = scmp.ne.s32.totalorder %s2196_s16, %s1971_s22  ;;  %s1976_s6 = sshll.u32 %s2059_s24, 4  ;;  %s1977_s6 = int_to_ptr.vmem [resolvable:$false] %s1976_s6 }
  0x3c   : > { %s1978_s7 = scalar_lea.vmem %s1977_s6, 98304  ;;  %p1979_p4 = scmp.lt.s32.totalorder %s2196_s16, %s1977_s6 }
  0x3d   : > { %p1974_p10 = pnand %p1972_p3, %p1932_p0  ;;  %p1980_p5 = scmp.lt.s32.totalorder %s1978_s7, %s1971_s22 }
  0x3f   : > { %p1975_p11 = pneg %p1974_p10  ;;  %p1981_p6 = por %p1980_p5, %p1979_p4 }
  0x41   : > { %p1982_p8 = pnand %p1981_p6, %p1975_p11 }
  0x43   : > { %1985 = shalt.err (!%p1982_p8)
}
  0x44   : > { %1887 = dma.hbm_to_vmem [thread:$0]  (!%p2143_p12), %s2192_s8, 49152, %s2196_s16, %s140_s27, %s2057_s29, %s2057_s29, %s2058_s4  }
  0x45   : > { %163 = sbr.rel (%p2183_p2) target bundleno = 392 (0x188), region = 28  ;;  %s2227_s14 = sand.u32 (!%p2183_p2), 1, %s2046_s10  }
  0x46   : > { %s1873_s30 = smul.u32 (!%p2183_p2), 3072, %s2227_s14  ;;  %s166_s3 = scalar_lea.sflag (!%p2183_p2), [#allocation3], %s2227_s14 }
  0x47   : > { %p3457_p6 = scmp.ne.s32.totalorder (!%p2183_p2), %s3452_s19, 0 }
  0x48   : > { %s2231_s17 = scalar_lea.vmem (!%p2183_p2), [#allocation2], %s1873_s30 }
  0x4a   : > { %2029 = dma.done.wait (%p3457_p6), %s166_s3, 49152  }
  0x4b   : > { %2031 = vsyncadd (%p3457_p6), %s166_s3, 4294918144  ;;  %s175_s28 = scalar_lea.sflag [#allocation6], %s2227_s14  ;;  %s2238_s29 = scalar_lea.vmem [#allocation5], %s1873_s30 }
  0x4c   : > { %2033 = dma.done.wait (%p3457_p6), %s175_s28, 49152  }
  0x4d   : > { %2035 = vsyncadd (%p3457_p6), %s175_s28, 4294918144  ;;  %v207_v0 = vld [vmem:[%s2238_s29] sm:$0xff]  ;;  %v208_v2 = vld [vmem:[%s2238_s29 + $0x8] sm:$0xff]  ;;  %s2253_s19 = scalar_lea.vmem [#allocation7], %s1873_s30  ;;  %s1874_s4 = smul.u32 49152, %s2099_s13 }
  0x4e   : > { %v591_v1 = vld [vmem:[%s2231_s17] sm:$0xff]  ;;  %v592_v4 = vld [vmem:[%s2231_s17 + $0x8] sm:$0xff]  ;;  %v209_v5 = vld [vmem:[%s2238_s29 + $0x10] sm:$0xff]  ;;  %s1758_s5 = sshll.u32 %s2253_s19, 4  ;;  %s1744_s27 = scalar_lea.sflag [#allocation4], %s2227_s14  ;;  %s3400_s5 = int_to_ptr.vmem [resolvable:$true] %s1758_s5 }
  0x4f   : > { %v975_v3 = vsub.f32 %v207_v0, %v591_v1  ;;  %v593_v6 = vld [vmem:[%s2231_s17 + $0x10] sm:$0xff]  ;;  %v976_v7 = vsub.f32 %v208_v2, %v592_v4  ;;  %v210_v9 = vld [vmem:[%s2238_s29 + $0x18] sm:$0xff]  ;;  %v211_v11 = vld [vmem:[%s2238_s29 + $0x20] sm:$0xff]  ;;  %s3398_s16 = scalar_lea.hbm %s3449_s2, %s1874_s4  ;;  %s1986_s23 = scalar_lea.vmem %s3400_s5, 49152 }
  0x50   : > { %v977_v8 = vsub.f32 %v209_v5, %v593_v6  ;;  %v594_v10 = vld [vmem:[%s2231_s17 + $0x18] sm:$0xff]  ;;  %v595_v13 = vld [vmem:[%s2231_s17 + $0x20] sm:$0xff]  ;;  %v212_v14 = vld [vmem:[%s2238_s29 + $0x28] sm:$0xff]  ;;  %p1987_p12 = scmp.ne.s32.totalorder %s3400_s5, %s1986_s23  ;;  %p3458_p0 = scmp.ne.s32.totalorder %s3453_s20, 0 }
  0x51   : > { %1359 = vst [vmem:[%s2253_s19] sm:$0xff] %v975_v3  ;;  %v978_v12 = vsub.f32 %v210_v9, %v594_v10  ;;  %v596_v15 = vld [vmem:[%s2231_s17 + $0x28] sm:$0xff]  ;;  %1360 = vst [vmem:[%s2253_s19 + $0x8] sm:$0xff] %v976_v7  ;;  %v979_v16 = vsub.f32 %v211_v11, %v595_v13  ;;  %v213_v18 = vld [vmem:[%s2238_s29 + $0x30] sm:$0xff]  ;;  %s2060_s25 = smov [#allocation7]  }
  0x52   : > { %1361 = vst [vmem:[%s2253_s19 + $0x10] sm:$0xff] %v977_v8  ;;  %v980_v17 = vsub.f32 %v212_v14, %v596_v15  ;;  %v597_v19 = vld [vmem:[%s2231_s17 + $0x30] sm:$0xff]  ;;  %v214_v20 = vld [vmem:[%s2238_s29 + $0x38] sm:$0xff]  ;;  %v215_v23 = vld [vmem:[%s2238_s29 + $0x40] sm:$0xff]  ;;  %p1988_p2 = pnand %p1987_p12, %p3458_p0  ;;  %s1990_s26 = sshll.u32 %s2060_s25, 4  ;;  %s1991_s26 = int_to_ptr.vmem [resolvable:$false] %s1990_s26 }
  0x53   : > { %1362 = vst [vmem:[%s2253_s19 + $0x18] sm:$0xff] %v978_v12  ;;  %v981_v21 = vsub.f32 %v213_v18, %v597_v19  ;;  %v598_v22 = vld [vmem:[%s2231_s17 + $0x38] sm:$0xff]  ;;  %v599_v24 = vld [vmem:[%s2231_s17 + $0x40] sm:$0xff]  ;;  %1363 = vst [vmem:[%s2253_s19 + $0x20] sm:$0xff] %v979_v16  ;;  %s1992_s22 = scalar_lea.vmem %s1991_s26, 98304  ;;  %p1993_p9 = scmp.lt.s32.totalorder %s3400_s5, %s1991_s26 }
  0x54   : > { %1364 = vst [vmem:[%s2253_s19 + $0x28] sm:$0xff] %v980_v17  ;;  %v982_v25 = vsub.f32 %v214_v20, %v598_v22  ;;  %v983_v26 = vsub.f32 %v215_v23, %v599_v24  ;;  %v216_v27 = vld [vmem:[%s2238_s29 + $0x48] sm:$0xff]  ;;  %v217_v29 = vld [vmem:[%s2238_s29 + $0x50] sm:$0xff]  ;;  %v218_v32 = vld [vmem:[%s2238_s29 + $0x58] sm:$0xff]  ;;  %p1989_p7 = pneg %p1988_p2  ;;  %p1994_p13 = scmp.lt.s32.totalorder %s1992_s22, %s1986_s23 }
  0x55   : > { %v600_v28 = vld [vmem:[%s2231_s17 + $0x48] sm:$0xff]  ;;  %1365 = vst [vmem:[%s2253_s19 + $0x30] sm:$0xff] %v981_v21  ;;  %v601_v31 = vld [vmem:[%s2231_s17 + $0x50] sm:$0xff]  ;;  %v602_v33 = vld [vmem:[%s2231_s17 + $0x58] sm:$0xff] }
  0x56   : > { %v984_v30 = vsub.f32 %v216_v27, %v600_v28  ;;  %1366 = vst [vmem:[%s2253_s19 + $0x38] sm:$0xff] %v982_v25  ;;  %1367 = vst [vmem:[%s2253_s19 + $0x40] sm:$0xff] %v983_v26  ;;  %v985_v34 = vsub.f32 %v217_v29, %v601_v31  ;;  %v986_v35 = vsub.f32 %v218_v32, %v602_v33  ;;  %v219_v36 = vld [vmem:[%s2238_s29 + $0x60] sm:$0xff]  ;;  %v220_v38 = vld [vmem:[%s2238_s29 + $0x68] sm:$0xff]  ;;  %p1995_p1 = por %p1994_p13, %p1993_p9 }
  0x57   : > { %v603_v37 = vld [vmem:[%s2231_s17 + $0x60] sm:$0xff]  ;;  %v604_v40 = vld [vmem:[%s2231_s17 + $0x68] sm:$0xff]  ;;  %v221_v41 = vld [vmem:[%s2238_s29 + $0x70] sm:$0xff] }
  0x58   : > { %1368 = vst [vmem:[%s2253_s19 + $0x48] sm:$0xff] %v984_v30  ;;  %v987_v39 = vsub.f32 %v219_v36, %v603_v37  ;;  %v605_v42 = vld [vmem:[%s2231_s17 + $0x70] sm:$0xff]  ;;  %1369 = vst [vmem:[%s2253_s19 + $0x50] sm:$0xff] %v985_v34  ;;  %v988_v43 = vsub.f32 %v220_v38, %v604_v40  ;;  %v222_v45 = vld [vmem:[%s2238_s29 + $0x78] sm:$0xff]  ;;  %p1996_p3 = pnand %p1995_p1, %p1989_p7 }
  0x59   : > { %1370 = vst [vmem:[%s2253_s19 + $0x58] sm:$0xff] %v986_v35  ;;  %v989_v44 = vsub.f32 %v221_v41, %v605_v42  ;;  %v606_v46 = vld [vmem:[%s2231_s17 + $0x78] sm:$0xff]  ;;  %v223_v47 = vld [vmem:[%s2238_s29 + $0x80] sm:$0xff]  ;;  %v224_v50 = vld [vmem:[%s2238_s29 + $0x88] sm:$0xff] }
  0x5a   : > { %1371 = vst [vmem:[%s2253_s19 + $0x60] sm:$0xff] %v987_v39  ;;  %v990_v48 = vsub.f32 %v222_v45, %v606_v46  ;;  %v607_v49 = vld [vmem:[%s2231_s17 + $0x80] sm:$0xff]  ;;  %v608_v51 = vld [vmem:[%s2231_s17 + $0x88] sm:$0xff]  ;;  %1372 = vst [vmem:[%s2253_s19 + $0x68] sm:$0xff] %v988_v43 }
  0x5b   : > { %1373 = vst [vmem:[%s2253_s19 + $0x70] sm:$0xff] %v989_v44  ;;  %v991_v52 = vsub.f32 %v223_v47, %v607_v49  ;;  %v992_v53 = vsub.f32 %v224_v50, %v608_v51  ;;  %v225_v54 = vld [vmem:[%s2238_s29 + $0x90] sm:$0xff]  ;;  %v226_v56 = vld [vmem:[%s2238_s29 + $0x98] sm:$0xff]  ;;  %v227_v59 = vld [vmem:[%s2238_s29 + $0xa0] sm:$0xff] }
  0x5c   : > { %v609_v55 = vld [vmem:[%s2231_s17 + $0x90] sm:$0xff]  ;;  %1374 = vst [vmem:[%s2253_s19 + $0x78] sm:$0xff] %v990_v48  ;;  %v610_v58 = vld [vmem:[%s2231_s17 + $0x98] sm:$0xff]  ;;  %v611_v60 = vld [vmem:[%s2231_s17 + $0xa0] sm:$0xff] }
  0x5d   : > { %v993_v57 = vsub.f32 %v225_v54, %v609_v55  ;;  %1375 = vst [vmem:[%s2253_s19 + $0x80] sm:$0xff] %v991_v52  ;;  %1376 = vst [vmem:[%s2253_s19 + $0x88] sm:$0xff] %v992_v53  ;;  %v994_v61 = vsub.f32 %v226_v56, %v610_v58  ;;  %v995_v62 = vsub.f32 %v227_v59, %v611_v60  ;;  %v228_v63 = vld [vmem:[%s2238_s29 + $0xa8] sm:$0xff]  ;;  %v229_v1 = vld [vmem:[%s2238_s29 + $0xb0] sm:$0xff] }
  0x5e   : > { %v612_v0 = vld [vmem:[%s2231_s17 + $0xa8] sm:$0xff]  ;;  %v613_v3 = vld [vmem:[%s2231_s17 + $0xb0] sm:$0xff]  ;;  %v230_v4 = vld [vmem:[%s2238_s29 + $0xb8] sm:$0xff] }
  0x5f   : > { %1377 = vst [vmem:[%s2253_s19 + $0x90] sm:$0xff] %v993_v57  ;;  %v996_v2 = vsub.f32 %v228_v63, %v612_v0  ;;  %v614_v5 = vld [vmem:[%s2231_s17 + $0xb8] sm:$0xff]  ;;  %1378 = vst [vmem:[%s2253_s19 + $0x98] sm:$0xff] %v994_v61  ;;  %v997_v6 = vsub.f32 %v229_v1, %v613_v3  ;;  %v231_v8 = vld [vmem:[%s2238_s29 + $0xc0] sm:$0xff] }
  0x60   : > { %1379 = vst [vmem:[%s2253_s19 + $0xa0] sm:$0xff] %v995_v62  ;;  %v998_v7 = vsub.f32 %v230_v4, %v614_v5  ;;  %v615_v9 = vld [vmem:[%s2231_s17 + $0xc0] sm:$0xff]  ;;  %v232_v10 = vld [vmem:[%s2238_s29 + $0xc8] sm:$0xff]  ;;  %v233_v13 = vld [vmem:[%s2238_s29 + $0xd0] sm:$0xff] }
  0x61   : > { %1380 = vst [vmem:[%s2253_s19 + $0xa8] sm:$0xff] %v996_v2  ;;  %v999_v11 = vsub.f32 %v231_v8, %v615_v9  ;;  %v616_v12 = vld [vmem:[%s2231_s17 + $0xc8] sm:$0xff]  ;;  %v617_v14 = vld [vmem:[%s2231_s17 + $0xd0] sm:$0xff]  ;;  %1381 = vst [vmem:[%s2253_s19 + $0xb0] sm:$0xff] %v997_v6 }
  0x62   : > { %1382 = vst [vmem:[%s2253_s19 + $0xb8] sm:$0xff] %v998_v7  ;;  %v1000_v15 = vsub.f32 %v232_v10, %v616_v12  ;;  %v1001_v16 = vsub.f32 %v233_v13, %v617_v14  ;;  %v234_v17 = vld [vmem:[%s2238_s29 + $0xd8] sm:$0xff]  ;;  %v235_v19 = vld [vmem:[%s2238_s29 + $0xe0] sm:$0xff]  ;;  %v236_v22 = vld [vmem:[%s2238_s29 + $0xe8] sm:$0xff] }
  0x63   : > { %v618_v18 = vld [vmem:[%s2231_s17 + $0xd8] sm:$0xff]  ;;  %1383 = vst [vmem:[%s2253_s19 + $0xc0] sm:$0xff] %v999_v11  ;;  %v619_v21 = vld [vmem:[%s2231_s17 + $0xe0] sm:$0xff]  ;;  %v620_v23 = vld [vmem:[%s2231_s17 + $0xe8] sm:$0xff] }
  0x64   : > { %v1002_v20 = vsub.f32 %v234_v17, %v618_v18  ;;  %1384 = vst [vmem:[%s2253_s19 + $0xc8] sm:$0xff] %v1000_v15  ;;  %1385 = vst [vmem:[%s2253_s19 + $0xd0] sm:$0xff] %v1001_v16  ;;  %v1003_v24 = vsub.f32 %v235_v19, %v619_v21  ;;  %v1004_v25 = vsub.f32 %v236_v22, %v620_v23  ;;  %v237_v26 = vld [vmem:[%s2238_s29 + $0xf0] sm:$0xff]  ;;  %v238_v28 = vld [vmem:[%s2238_s29 + $0xf8] sm:$0xff] }
  0x65   : > { %v621_v27 = vld [vmem:[%s2231_s17 + $0xf0] sm:$0xff]  ;;  %v622_v30 = vld [vmem:[%s2231_s17 + $0xf8] sm:$0xff]  ;;  %v239_v31 = vld [vmem:[%s2238_s29 + $0x100] sm:$0xff] }
  0x66   : > { %1386 = vst [vmem:[%s2253_s19 + $0xd8] sm:$0xff] %v1002_v20  ;;  %v1005_v29 = vsub.f32 %v237_v26, %v621_v27  ;;  %v623_v32 = vld [vmem:[%s2231_s17 + $0x100] sm:$0xff]  ;;  %1387 = vst [vmem:[%s2253_s19 + $0xe0] sm:$0xff] %v1003_v24  ;;  %v1006_v33 = vsub.f32 %v238_v28, %v622_v30  ;;  %v240_v35 = vld [vmem:[%s2238_s29 + $0x108] sm:$0xff] }
  0x67   : > { %1388 = vst [vmem:[%s2253_s19 + $0xe8] sm:$0xff] %v1004_v25  ;;  %v1007_v34 = vsub.f32 %v239_v31, %v623_v32  ;;  %v624_v36 = vld [vmem:[%s2231_s17 + $0x108] sm:$0xff]  ;;  %v241_v37 = vld [vmem:[%s2238_s29 + $0x110] sm:$0xff]  ;;  %v242_v40 = vld [vmem:[%s2238_s29 + $0x118] sm:$0xff] }
  0x68   : > { %1389 = vst [vmem:[%s2253_s19 + $0xf0] sm:$0xff] %v1005_v29  ;;  %v1008_v38 = vsub.f32 %v240_v35, %v624_v36  ;;  %v625_v39 = vld [vmem:[%s2231_s17 + $0x110] sm:$0xff]  ;;  %v626_v41 = vld [vmem:[%s2231_s17 + $0x118] sm:$0xff]  ;;  %1390 = vst [vmem:[%s2253_s19 + $0xf8] sm:$0xff] %v1006_v33 }
  0x69   : > { %1391 = vst [vmem:[%s2253_s19 + $0x100] sm:$0xff] %v1007_v34  ;;  %v1009_v42 = vsub.f32 %v241_v37, %v625_v39  ;;  %v1010_v43 = vsub.f32 %v242_v40, %v626_v41  ;;  %v243_v44 = vld [vmem:[%s2238_s29 + $0x120] sm:$0xff]  ;;  %v244_v46 = vld [vmem:[%s2238_s29 + $0x128] sm:$0xff]  ;;  %v245_v49 = vld [vmem:[%s2238_s29 + $0x130] sm:$0xff] }
  0x6a   : > { %v627_v45 = vld [vmem:[%s2231_s17 + $0x120] sm:$0xff]  ;;  %1392 = vst [vmem:[%s2253_s19 + $0x108] sm:$0xff] %v1008_v38  ;;  %v628_v48 = vld [vmem:[%s2231_s17 + $0x128] sm:$0xff]  ;;  %v629_v50 = vld [vmem:[%s2231_s17 + $0x130] sm:$0xff] }
  0x6b   : > { %v1011_v47 = vsub.f32 %v243_v44, %v627_v45  ;;  %1393 = vst [vmem:[%s2253_s19 + $0x110] sm:$0xff] %v1009_v42  ;;  %1394 = vst [vmem:[%s2253_s19 + $0x118] sm:$0xff] %v1010_v43  ;;  %v1012_v51 = vsub.f32 %v244_v46, %v628_v48  ;;  %v1013_v52 = vsub.f32 %v245_v49, %v629_v50  ;;  %v246_v53 = vld [vmem:[%s2238_s29 + $0x138] sm:$0xff]  ;;  %v247_v55 = vld [vmem:[%s2238_s29 + $0x140] sm:$0xff] }
  0x6c   : > { %v630_v54 = vld [vmem:[%s2231_s17 + $0x138] sm:$0xff]  ;;  %v631_v57 = vld [vmem:[%s2231_s17 + $0x140] sm:$0xff]  ;;  %v248_v58 = vld [vmem:[%s2238_s29 + $0x148] sm:$0xff] }
  0x6d   : > { %1395 = vst [vmem:[%s2253_s19 + $0x120] sm:$0xff] %v1011_v47  ;;  %v1014_v56 = vsub.f32 %v246_v53, %v630_v54  ;;  %v632_v59 = vld [vmem:[%s2231_s17 + $0x148] sm:$0xff]  ;;  %1396 = vst [vmem:[%s2253_s19 + $0x128] sm:$0xff] %v1012_v51  ;;  %v1015_v60 = vsub.f32 %v247_v55, %v631_v57  ;;  %v249_v62 = vld [vmem:[%s2238_s29 + $0x150] sm:$0xff] }
  0x6e   : > { %1397 = vst [vmem:[%s2253_s19 + $0x130] sm:$0xff] %v1013_v52  ;;  %v1016_v61 = vsub.f32 %v248_v58, %v632_v59  ;;  %v633_v63 = vld [vmem:[%s2231_s17 + $0x150] sm:$0xff]  ;;  %v250_v0 = vld [vmem:[%s2238_s29 + $0x158] sm:$0xff]  ;;  %v251_v3 = vld [vmem:[%s2238_s29 + $0x160] sm:$0xff] }
  0x6f   : > { %1398 = vst [vmem:[%s2253_s19 + $0x138] sm:$0xff] %v1014_v56  ;;  %v1017_v1 = vsub.f32 %v249_v62, %v633_v63  ;;  %v634_v2 = vld [vmem:[%s2231_s17 + $0x158] sm:$0xff]  ;;  %v635_v4 = vld [vmem:[%s2231_s17 + $0x160] sm:$0xff]  ;;  %1399 = vst [vmem:[%s2253_s19 + $0x140] sm:$0xff] %v1015_v60 }
  0x70   : > { %1400 = vst [vmem:[%s2253_s19 + $0x148] sm:$0xff] %v1016_v61  ;;  %v1018_v5 = vsub.f32 %v250_v0, %v634_v2  ;;  %v1019_v6 = vsub.f32 %v251_v3, %v635_v4  ;;  %v252_v7 = vld [vmem:[%s2238_s29 + $0x168] sm:$0xff]  ;;  %v253_v9 = vld [vmem:[%s2238_s29 + $0x170] sm:$0xff]  ;;  %v254_v12 = vld [vmem:[%s2238_s29 + $0x178] sm:$0xff] }
  0x71   : > { %v636_v8 = vld [vmem:[%s2231_s17 + $0x168] sm:$0xff]  ;;  %1401 = vst [vmem:[%s2253_s19 + $0x150] sm:$0xff] %v1017_v1  ;;  %v637_v11 = vld [vmem:[%s2231_s17 + $0x170] sm:$0xff]  ;;  %v638_v13 = vld [vmem:[%s2231_s17 + $0x178] sm:$0xff] }
  0x72   : > { %v1020_v10 = vsub.f32 %v252_v7, %v636_v8  ;;  %1402 = vst [vmem:[%s2253_s19 + $0x158] sm:$0xff] %v1018_v5  ;;  %1403 = vst [vmem:[%s2253_s19 + $0x160] sm:$0xff] %v1019_v6  ;;  %v1021_v14 = vsub.f32 %v253_v9, %v637_v11  ;;  %v1022_v15 = vsub.f32 %v254_v12, %v638_v13  ;;  %v255_v16 = vld [vmem:[%s2238_s29 + $0x180] sm:$0xff]  ;;  %v256_v18 = vld [vmem:[%s2238_s29 + $0x188] sm:$0xff] }
  0x73   : > { %v639_v17 = vld [vmem:[%s2231_s17 + $0x180] sm:$0xff]  ;;  %v640_v20 = vld [vmem:[%s2231_s17 + $0x188] sm:$0xff]  ;;  %v257_v21 = vld [vmem:[%s2238_s29 + $0x190] sm:$0xff] }
  0x74   : > { %1404 = vst [vmem:[%s2253_s19 + $0x168] sm:$0xff] %v1020_v10  ;;  %v1023_v19 = vsub.f32 %v255_v16, %v639_v17  ;;  %v641_v22 = vld [vmem:[%s2231_s17 + $0x190] sm:$0xff]  ;;  %1405 = vst [vmem:[%s2253_s19 + $0x170] sm:$0xff] %v1021_v14  ;;  %v1024_v23 = vsub.f32 %v256_v18, %v640_v20  ;;  %v258_v25 = vld [vmem:[%s2238_s29 + $0x198] sm:$0xff] }
  0x75   : > { %1406 = vst [vmem:[%s2253_s19 + $0x178] sm:$0xff] %v1022_v15  ;;  %v1025_v24 = vsub.f32 %v257_v21, %v641_v22  ;;  %v642_v26 = vld [vmem:[%s2231_s17 + $0x198] sm:$0xff]  ;;  %v259_v27 = vld [vmem:[%s2238_s29 + $0x1a0] sm:$0xff]  ;;  %v260_v30 = vld [vmem:[%s2238_s29 + $0x1a8] sm:$0xff] }
  0x76   : > { %1407 = vst [vmem:[%s2253_s19 + $0x180] sm:$0xff] %v1023_v19  ;;  %v1026_v28 = vsub.f32 %v258_v25, %v642_v26  ;;  %v643_v29 = vld [vmem:[%s2231_s17 + $0x1a0] sm:$0xff]  ;;  %v644_v31 = vld [vmem:[%s2231_s17 + $0x1a8] sm:$0xff]  ;;  %1408 = vst [vmem:[%s2253_s19 + $0x188] sm:$0xff] %v1024_v23 }
  0x77   : > { %1409 = vst [vmem:[%s2253_s19 + $0x190] sm:$0xff] %v1025_v24  ;;  %v1027_v32 = vsub.f32 %v259_v27, %v643_v29  ;;  %v1028_v33 = vsub.f32 %v260_v30, %v644_v31  ;;  %v261_v34 = vld [vmem:[%s2238_s29 + $0x1b0] sm:$0xff]  ;;  %v262_v36 = vld [vmem:[%s2238_s29 + $0x1b8] sm:$0xff]  ;;  %v263_v39 = vld [vmem:[%s2238_s29 + $0x1c0] sm:$0xff] }
  0x78   : > { %v645_v35 = vld [vmem:[%s2231_s17 + $0x1b0] sm:$0xff]  ;;  %1410 = vst [vmem:[%s2253_s19 + $0x198] sm:$0xff] %v1026_v28  ;;  %v646_v38 = vld [vmem:[%s2231_s17 + $0x1b8] sm:$0xff]  ;;  %v647_v40 = vld [vmem:[%s2231_s17 + $0x1c0] sm:$0xff] }
  0x79   : > { %v1029_v37 = vsub.f32 %v261_v34, %v645_v35  ;;  %1411 = vst [vmem:[%s2253_s19 + $0x1a0] sm:$0xff] %v1027_v32  ;;  %1412 = vst [vmem:[%s2253_s19 + $0x1a8] sm:$0xff] %v1028_v33  ;;  %v1030_v41 = vsub.f32 %v262_v36, %v646_v38  ;;  %v1031_v42 = vsub.f32 %v263_v39, %v647_v40  ;;  %v264_v43 = vld [vmem:[%s2238_s29 + $0x1c8] sm:$0xff]  ;;  %v265_v45 = vld [vmem:[%s2238_s29 + $0x1d0] sm:$0xff] }
  0x7a   : > { %v648_v44 = vld [vmem:[%s2231_s17 + $0x1c8] sm:$0xff]  ;;  %v649_v47 = vld [vmem:[%s2231_s17 + $0x1d0] sm:$0xff]  ;;  %v266_v48 = vld [vmem:[%s2238_s29 + $0x1d8] sm:$0xff] }
  0x7b   : > { %1413 = vst [vmem:[%s2253_s19 + $0x1b0] sm:$0xff] %v1029_v37  ;;  %v1032_v46 = vsub.f32 %v264_v43, %v648_v44  ;;  %v650_v49 = vld [vmem:[%s2231_s17 + $0x1d8] sm:$0xff]  ;;  %1414 = vst [vmem:[%s2253_s19 + $0x1b8] sm:$0xff] %v1030_v41  ;;  %v1033_v50 = vsub.f32 %v265_v45, %v649_v47  ;;  %v267_v52 = vld [vmem:[%s2238_s29 + $0x1e0] sm:$0xff] }
  0x7c   : > { %1415 = vst [vmem:[%s2253_s19 + $0x1c0] sm:$0xff] %v1031_v42  ;;  %v1034_v51 = vsub.f32 %v266_v48, %v650_v49  ;;  %v651_v53 = vld [vmem:[%s2231_s17 + $0x1e0] sm:$0xff]  ;;  %v268_v54 = vld [vmem:[%s2238_s29 + $0x1e8] sm:$0xff]  ;;  %v269_v57 = vld [vmem:[%s2238_s29 + $0x1f0] sm:$0xff] }
  0x7d   : > { %1416 = vst [vmem:[%s2253_s19 + $0x1c8] sm:$0xff] %v1032_v46  ;;  %v1035_v55 = vsub.f32 %v267_v52, %v651_v53  ;;  %v652_v56 = vld [vmem:[%s2231_s17 + $0x1e8] sm:$0xff]  ;;  %v653_v58 = vld [vmem:[%s2231_s17 + $0x1f0] sm:$0xff]  ;;  %1417 = vst [vmem:[%s2253_s19 + $0x1d0] sm:$0xff] %v1033_v50 }
  0x7e   : > { %1418 = vst [vmem:[%s2253_s19 + $0x1d8] sm:$0xff] %v1034_v51  ;;  %v1036_v59 = vsub.f32 %v268_v54, %v652_v56  ;;  %v1037_v60 = vsub.f32 %v269_v57, %v653_v58  ;;  %v270_v61 = vld [vmem:[%s2238_s29 + $0x1f8] sm:$0xff]  ;;  %v271_v63 = vld [vmem:[%s2238_s29 + $0x200] sm:$0xff]  ;;  %v272_v2 = vld [vmem:[%s2238_s29 + $0x208] sm:$0xff] }
  0x7f   : > { %v654_v62 = vld [vmem:[%s2231_s17 + $0x1f8] sm:$0xff]  ;;  %1419 = vst [vmem:[%s2253_s19 + $0x1e0] sm:$0xff] %v1035_v55  ;;  %v655_v1 = vld [vmem:[%s2231_s17 + $0x200] sm:$0xff]  ;;  %v656_v3 = vld [vmem:[%s2231_s17 + $0x208] sm:$0xff] }
  0x80   : > { %v1038_v0 = vsub.f32 %v270_v61, %v654_v62  ;;  %1420 = vst [vmem:[%s2253_s19 + $0x1e8] sm:$0xff] %v1036_v59  ;;  %1421 = vst [vmem:[%s2253_s19 + $0x1f0] sm:$0xff] %v1037_v60  ;;  %v1039_v4 = vsub.f32 %v271_v63, %v655_v1  ;;  %v1040_v5 = vsub.f32 %v272_v2, %v656_v3  ;;  %v273_v6 = vld [vmem:[%s2238_s29 + $0x210] sm:$0xff]  ;;  %v274_v8 = vld [vmem:[%s2238_s29 + $0x218] sm:$0xff] }
  0x81   : > { %v657_v7 = vld [vmem:[%s2231_s17 + $0x210] sm:$0xff]  ;;  %v658_v10 = vld [vmem:[%s2231_s17 + $0x218] sm:$0xff]  ;;  %v275_v11 = vld [vmem:[%s2238_s29 + $0x220] sm:$0xff] }
  0x82   : > { %1422 = vst [vmem:[%s2253_s19 + $0x1f8] sm:$0xff] %v1038_v0  ;;  %v1041_v9 = vsub.f32 %v273_v6, %v657_v7  ;;  %v659_v12 = vld [vmem:[%s2231_s17 + $0x220] sm:$0xff]  ;;  %1423 = vst [vmem:[%s2253_s19 + $0x200] sm:$0xff] %v1039_v4  ;;  %v1042_v13 = vsub.f32 %v274_v8, %v658_v10  ;;  %v276_v15 = vld [vmem:[%s2238_s29 + $0x228] sm:$0xff] }
  0x83   : > { %1424 = vst [vmem:[%s2253_s19 + $0x208] sm:$0xff] %v1040_v5  ;;  %v1043_v14 = vsub.f32 %v275_v11, %v659_v12  ;;  %v660_v16 = vld [vmem:[%s2231_s17 + $0x228] sm:$0xff]  ;;  %v277_v17 = vld [vmem:[%s2238_s29 + $0x230] sm:$0xff]  ;;  %v278_v20 = vld [vmem:[%s2238_s29 + $0x238] sm:$0xff] }
  0x84   : > { %1425 = vst [vmem:[%s2253_s19 + $0x210] sm:$0xff] %v1041_v9  ;;  %v1044_v18 = vsub.f32 %v276_v15, %v660_v16  ;;  %v661_v19 = vld [vmem:[%s2231_s17 + $0x230] sm:$0xff]  ;;  %v662_v21 = vld [vmem:[%s2231_s17 + $0x238] sm:$0xff]  ;;  %1426 = vst [vmem:[%s2253_s19 + $0x218] sm:$0xff] %v1042_v13 }
  0x85   : > { %1427 = vst [vmem:[%s2253_s19 + $0x220] sm:$0xff] %v1043_v14  ;;  %v1045_v22 = vsub.f32 %v277_v17, %v661_v19  ;;  %v1046_v23 = vsub.f32 %v278_v20, %v662_v21  ;;  %v279_v24 = vld [vmem:[%s2238_s29 + $0x240] sm:$0xff]  ;;  %v280_v26 = vld [vmem:[%s2238_s29 + $0x248] sm:$0xff]  ;;  %v281_v29 = vld [vmem:[%s2238_s29 + $0x250] sm:$0xff] }
  0x86   : > { %v663_v25 = vld [vmem:[%s2231_s17 + $0x240] sm:$0xff]  ;;  %1428 = vst [vmem:[%s2253_s19 + $0x228] sm:$0xff] %v1044_v18  ;;  %v664_v28 = vld [vmem:[%s2231_s17 + $0x248] sm:$0xff]  ;;  %v665_v30 = vld [vmem:[%s2231_s17 + $0x250] sm:$0xff] }
  0x87   : > { %v1047_v27 = vsub.f32 %v279_v24, %v663_v25  ;;  %1429 = vst [vmem:[%s2253_s19 + $0x230] sm:$0xff] %v1045_v22  ;;  %1430 = vst [vmem:[%s2253_s19 + $0x238] sm:$0xff] %v1046_v23  ;;  %v1048_v31 = vsub.f32 %v280_v26, %v664_v28  ;;  %v1049_v32 = vsub.f32 %v281_v29, %v665_v30  ;;  %v282_v33 = vld [vmem:[%s2238_s29 + $0x258] sm:$0xff]  ;;  %v283_v35 = vld [vmem:[%s2238_s29 + $0x260] sm:$0xff] }
  0x88   : > { %v666_v34 = vld [vmem:[%s2231_s17 + $0x258] sm:$0xff]  ;;  %v667_v37 = vld [vmem:[%s2231_s17 + $0x260] sm:$0xff]  ;;  %v284_v38 = vld [vmem:[%s2238_s29 + $0x268] sm:$0xff] }
  0x89   : > { %1431 = vst [vmem:[%s2253_s19 + $0x240] sm:$0xff] %v1047_v27  ;;  %v1050_v36 = vsub.f32 %v282_v33, %v666_v34  ;;  %v668_v39 = vld [vmem:[%s2231_s17 + $0x268] sm:$0xff]  ;;  %1432 = vst [vmem:[%s2253_s19 + $0x248] sm:$0xff] %v1048_v31  ;;  %v1051_v40 = vsub.f32 %v283_v35, %v667_v37  ;;  %v285_v42 = vld [vmem:[%s2238_s29 + $0x270] sm:$0xff] }
  0x8a   : > { %1433 = vst [vmem:[%s2253_s19 + $0x250] sm:$0xff] %v1049_v32  ;;  %v1052_v41 = vsub.f32 %v284_v38, %v668_v39  ;;  %v669_v43 = vld [vmem:[%s2231_s17 + $0x270] sm:$0xff]  ;;  %v286_v44 = vld [vmem:[%s2238_s29 + $0x278] sm:$0xff]  ;;  %v287_v47 = vld [vmem:[%s2238_s29 + $0x280] sm:$0xff] }
  0x8b   : > { %1434 = vst [vmem:[%s2253_s19 + $0x258] sm:$0xff] %v1050_v36  ;;  %v1053_v45 = vsub.f32 %v285_v42, %v669_v43  ;;  %v670_v46 = vld [vmem:[%s2231_s17 + $0x278] sm:$0xff]  ;;  %v671_v48 = vld [vmem:[%s2231_s17 + $0x280] sm:$0xff]  ;;  %1435 = vst [vmem:[%s2253_s19 + $0x260] sm:$0xff] %v1051_v40 }
  0x8c   : > { %1436 = vst [vmem:[%s2253_s19 + $0x268] sm:$0xff] %v1052_v41  ;;  %v1054_v49 = vsub.f32 %v286_v44, %v670_v46  ;;  %v1055_v50 = vsub.f32 %v287_v47, %v671_v48  ;;  %v288_v51 = vld [vmem:[%s2238_s29 + $0x288] sm:$0xff]  ;;  %v289_v53 = vld [vmem:[%s2238_s29 + $0x290] sm:$0xff]  ;;  %v290_v56 = vld [vmem:[%s2238_s29 + $0x298] sm:$0xff] }
  0x8d   : > { %v672_v52 = vld [vmem:[%s2231_s17 + $0x288] sm:$0xff]  ;;  %1437 = vst [vmem:[%s2253_s19 + $0x270] sm:$0xff] %v1053_v45  ;;  %v673_v55 = vld [vmem:[%s2231_s17 + $0x290] sm:$0xff]  ;;  %v674_v57 = vld [vmem:[%s2231_s17 + $0x298] sm:$0xff] }
  0x8e   : > { %v1056_v54 = vsub.f32 %v288_v51, %v672_v52  ;;  %1438 = vst [vmem:[%s2253_s19 + $0x278] sm:$0xff] %v1054_v49  ;;  %1439 = vst [vmem:[%s2253_s19 + $0x280] sm:$0xff] %v1055_v50  ;;  %v1057_v58 = vsub.f32 %v289_v53, %v673_v55  ;;  %v1058_v59 = vsub.f32 %v290_v56, %v674_v57  ;;  %v291_v60 = vld [vmem:[%s2238_s29 + $0x2a0] sm:$0xff]  ;;  %v292_v62 = vld [vmem:[%s2238_s29 + $0x2a8] sm:$0xff] }
  0x8f   : > { %v675_v61 = vld [vmem:[%s2231_s17 + $0x2a0] sm:$0xff]  ;;  %v676_v0 = vld [vmem:[%s2231_s17 + $0x2a8] sm:$0xff]  ;;  %v293_v1 = vld [vmem:[%s2238_s29 + $0x2b0] sm:$0xff] }
  0x90   : > { %1440 = vst [vmem:[%s2253_s19 + $0x288] sm:$0xff] %v1056_v54  ;;  %v1059_v63 = vsub.f32 %v291_v60, %v675_v61  ;;  %v677_v2 = vld [vmem:[%s2231_s17 + $0x2b0] sm:$0xff]  ;;  %1441 = vst [vmem:[%s2253_s19 + $0x290] sm:$0xff] %v1057_v58  ;;  %v1060_v3 = vsub.f32 %v292_v62, %v676_v0  ;;  %v294_v5 = vld [vmem:[%s2238_s29 + $0x2b8] sm:$0xff] }
  0x91   : > { %1442 = vst [vmem:[%s2253_s19 + $0x298] sm:$0xff] %v1058_v59  ;;  %v1061_v4 = vsub.f32 %v293_v1, %v677_v2  ;;  %v678_v6 = vld [vmem:[%s2231_s17 + $0x2b8] sm:$0xff]  ;;  %v295_v7 = vld [vmem:[%s2238_s29 + $0x2c0] sm:$0xff]  ;;  %v296_v10 = vld [vmem:[%s2238_s29 + $0x2c8] sm:$0xff] }
  0x92   : > { %1443 = vst [vmem:[%s2253_s19 + $0x2a0] sm:$0xff] %v1059_v63  ;;  %v1062_v8 = vsub.f32 %v294_v5, %v678_v6  ;;  %v679_v9 = vld [vmem:[%s2231_s17 + $0x2c0] sm:$0xff]  ;;  %v680_v11 = vld [vmem:[%s2231_s17 + $0x2c8] sm:$0xff]  ;;  %1444 = vst [vmem:[%s2253_s19 + $0x2a8] sm:$0xff] %v1060_v3 }
  0x93   : > { %1445 = vst [vmem:[%s2253_s19 + $0x2b0] sm:$0xff] %v1061_v4  ;;  %v1063_v12 = vsub.f32 %v295_v7, %v679_v9  ;;  %v1064_v13 = vsub.f32 %v296_v10, %v680_v11  ;;  %v297_v14 = vld [vmem:[%s2238_s29 + $0x2d0] sm:$0xff]  ;;  %v298_v16 = vld [vmem:[%s2238_s29 + $0x2d8] sm:$0xff]  ;;  %v299_v19 = vld [vmem:[%s2238_s29 + $0x2e0] sm:$0xff] }
  0x94   : > { %v681_v15 = vld [vmem:[%s2231_s17 + $0x2d0] sm:$0xff]  ;;  %1446 = vst [vmem:[%s2253_s19 + $0x2b8] sm:$0xff] %v1062_v8  ;;  %v682_v18 = vld [vmem:[%s2231_s17 + $0x2d8] sm:$0xff]  ;;  %v683_v20 = vld [vmem:[%s2231_s17 + $0x2e0] sm:$0xff] }
  0x95   : > { %v1065_v17 = vsub.f32 %v297_v14, %v681_v15  ;;  %1447 = vst [vmem:[%s2253_s19 + $0x2c0] sm:$0xff] %v1063_v12  ;;  %1448 = vst [vmem:[%s2253_s19 + $0x2c8] sm:$0xff] %v1064_v13  ;;  %v1066_v21 = vsub.f32 %v298_v16, %v682_v18  ;;  %v1067_v22 = vsub.f32 %v299_v19, %v683_v20  ;;  %v300_v23 = vld [vmem:[%s2238_s29 + $0x2e8] sm:$0xff]  ;;  %v301_v25 = vld [vmem:[%s2238_s29 + $0x2f0] sm:$0xff] }
  0x96   : > { %v684_v24 = vld [vmem:[%s2231_s17 + $0x2e8] sm:$0xff]  ;;  %v685_v27 = vld [vmem:[%s2231_s17 + $0x2f0] sm:$0xff]  ;;  %v302_v28 = vld [vmem:[%s2238_s29 + $0x2f8] sm:$0xff] }
  0x97   : > { %1449 = vst [vmem:[%s2253_s19 + $0x2d0] sm:$0xff] %v1065_v17  ;;  %v1068_v26 = vsub.f32 %v300_v23, %v684_v24  ;;  %v686_v29 = vld [vmem:[%s2231_s17 + $0x2f8] sm:$0xff]  ;;  %1450 = vst [vmem:[%s2253_s19 + $0x2d8] sm:$0xff] %v1066_v21  ;;  %v1069_v30 = vsub.f32 %v301_v25, %v685_v27  ;;  %v303_v32 = vld [vmem:[%s2238_s29 + $0x300] sm:$0xff] }
  0x98   : > { %1451 = vst [vmem:[%s2253_s19 + $0x2e0] sm:$0xff] %v1067_v22  ;;  %v1070_v31 = vsub.f32 %v302_v28, %v686_v29  ;;  %v687_v33 = vld [vmem:[%s2231_s17 + $0x300] sm:$0xff]  ;;  %v304_v34 = vld [vmem:[%s2238_s29 + $0x308] sm:$0xff]  ;;  %v305_v37 = vld [vmem:[%s2238_s29 + $0x310] sm:$0xff] }
  0x99   : > { %1452 = vst [vmem:[%s2253_s19 + $0x2e8] sm:$0xff] %v1068_v26  ;;  %v1071_v35 = vsub.f32 %v303_v32, %v687_v33  ;;  %v688_v36 = vld [vmem:[%s2231_s17 + $0x308] sm:$0xff]  ;;  %v689_v38 = vld [vmem:[%s2231_s17 + $0x310] sm:$0xff]  ;;  %1453 = vst [vmem:[%s2253_s19 + $0x2f0] sm:$0xff] %v1069_v30 }
  0x9a   : > { %1454 = vst [vmem:[%s2253_s19 + $0x2f8] sm:$0xff] %v1070_v31  ;;  %v1072_v39 = vsub.f32 %v304_v34, %v688_v36  ;;  %v1073_v40 = vsub.f32 %v305_v37, %v689_v38  ;;  %v306_v41 = vld [vmem:[%s2238_s29 + $0x318] sm:$0xff]  ;;  %v307_v43 = vld [vmem:[%s2238_s29 + $0x320] sm:$0xff]  ;;  %v308_v46 = vld [vmem:[%s2238_s29 + $0x328] sm:$0xff] }
  0x9b   : > { %v690_v42 = vld [vmem:[%s2231_s17 + $0x318] sm:$0xff]  ;;  %1455 = vst [vmem:[%s2253_s19 + $0x300] sm:$0xff] %v1071_v35  ;;  %v691_v45 = vld [vmem:[%s2231_s17 + $0x320] sm:$0xff]  ;;  %v692_v47 = vld [vmem:[%s2231_s17 + $0x328] sm:$0xff] }
  0x9c   : > { %v1074_v44 = vsub.f32 %v306_v41, %v690_v42  ;;  %1456 = vst [vmem:[%s2253_s19 + $0x308] sm:$0xff] %v1072_v39  ;;  %1457 = vst [vmem:[%s2253_s19 + $0x310] sm:$0xff] %v1073_v40  ;;  %v1075_v48 = vsub.f32 %v307_v43, %v691_v45  ;;  %v1076_v49 = vsub.f32 %v308_v46, %v692_v47  ;;  %v309_v50 = vld [vmem:[%s2238_s29 + $0x330] sm:$0xff]  ;;  %v310_v52 = vld [vmem:[%s2238_s29 + $0x338] sm:$0xff] }
  0x9d   : > { %v693_v51 = vld [vmem:[%s2231_s17 + $0x330] sm:$0xff]  ;;  %v694_v54 = vld [vmem:[%s2231_s17 + $0x338] sm:$0xff]  ;;  %v311_v55 = vld [vmem:[%s2238_s29 + $0x340] sm:$0xff] }
  0x9e   : > { %1458 = vst [vmem:[%s2253_s19 + $0x318] sm:$0xff] %v1074_v44  ;;  %v1077_v53 = vsub.f32 %v309_v50, %v693_v51  ;;  %v695_v56 = vld [vmem:[%s2231_s17 + $0x340] sm:$0xff]  ;;  %1459 = vst [vmem:[%s2253_s19 + $0x320] sm:$0xff] %v1075_v48  ;;  %v1078_v57 = vsub.f32 %v310_v52, %v694_v54  ;;  %v312_v59 = vld [vmem:[%s2238_s29 + $0x348] sm:$0xff] }
  0x9f   : > { %1460 = vst [vmem:[%s2253_s19 + $0x328] sm:$0xff] %v1076_v49  ;;  %v1079_v58 = vsub.f32 %v311_v55, %v695_v56  ;;  %v696_v60 = vld [vmem:[%s2231_s17 + $0x348] sm:$0xff]  ;;  %v313_v61 = vld [vmem:[%s2238_s29 + $0x350] sm:$0xff]  ;;  %v314_v0 = vld [vmem:[%s2238_s29 + $0x358] sm:$0xff] }
  0xa0   : > { %1461 = vst [vmem:[%s2253_s19 + $0x330] sm:$0xff] %v1077_v53  ;;  %v1080_v62 = vsub.f32 %v312_v59, %v696_v60  ;;  %v697_v63 = vld [vmem:[%s2231_s17 + $0x350] sm:$0xff]  ;;  %v698_v1 = vld [vmem:[%s2231_s17 + $0x358] sm:$0xff]  ;;  %1462 = vst [vmem:[%s2253_s19 + $0x338] sm:$0xff] %v1078_v57 }
  0xa1   : > { %1463 = vst [vmem:[%s2253_s19 + $0x340] sm:$0xff] %v1079_v58  ;;  %v1081_v2 = vsub.f32 %v313_v61, %v697_v63  ;;  %v1082_v3 = vsub.f32 %v314_v0, %v698_v1  ;;  %v315_v4 = vld [vmem:[%s2238_s29 + $0x360] sm:$0xff]  ;;  %v316_v6 = vld [vmem:[%s2238_s29 + $0x368] sm:$0xff]  ;;  %v317_v9 = vld [vmem:[%s2238_s29 + $0x370] sm:$0xff] }
  0xa2   : > { %v699_v5 = vld [vmem:[%s2231_s17 + $0x360] sm:$0xff]  ;;  %1464 = vst [vmem:[%s2253_s19 + $0x348] sm:$0xff] %v1080_v62  ;;  %v700_v8 = vld [vmem:[%s2231_s17 + $0x368] sm:$0xff]  ;;  %v701_v10 = vld [vmem:[%s2231_s17 + $0x370] sm:$0xff] }
  0xa3   : > { %v1083_v7 = vsub.f32 %v315_v4, %v699_v5  ;;  %1465 = vst [vmem:[%s2253_s19 + $0x350] sm:$0xff] %v1081_v2  ;;  %1466 = vst [vmem:[%s2253_s19 + $0x358] sm:$0xff] %v1082_v3  ;;  %v1084_v11 = vsub.f32 %v316_v6, %v700_v8  ;;  %v1085_v12 = vsub.f32 %v317_v9, %v701_v10  ;;  %v318_v13 = vld [vmem:[%s2238_s29 + $0x378] sm:$0xff]  ;;  %v319_v15 = vld [vmem:[%s2238_s29 + $0x380] sm:$0xff] }
  0xa4   : > { %v702_v14 = vld [vmem:[%s2231_s17 + $0x378] sm:$0xff]  ;;  %v703_v17 = vld [vmem:[%s2231_s17 + $0x380] sm:$0xff]  ;;  %v320_v18 = vld [vmem:[%s2238_s29 + $0x388] sm:$0xff] }
  0xa5   : > { %1467 = vst [vmem:[%s2253_s19 + $0x360] sm:$0xff] %v1083_v7  ;;  %v1086_v16 = vsub.f32 %v318_v13, %v702_v14  ;;  %v704_v19 = vld [vmem:[%s2231_s17 + $0x388] sm:$0xff]  ;;  %1468 = vst [vmem:[%s2253_s19 + $0x368] sm:$0xff] %v1084_v11  ;;  %v1087_v20 = vsub.f32 %v319_v15, %v703_v17  ;;  %v321_v22 = vld [vmem:[%s2238_s29 + $0x390] sm:$0xff] }
  0xa6   : > { %1469 = vst [vmem:[%s2253_s19 + $0x370] sm:$0xff] %v1085_v12  ;;  %v1088_v21 = vsub.f32 %v320_v18, %v704_v19  ;;  %v705_v23 = vld [vmem:[%s2231_s17 + $0x390] sm:$0xff]  ;;  %v322_v24 = vld [vmem:[%s2238_s29 + $0x398] sm:$0xff]  ;;  %v323_v27 = vld [vmem:[%s2238_s29 + $0x3a0] sm:$0xff] }
  0xa7   : > { %1470 = vst [vmem:[%s2253_s19 + $0x378] sm:$0xff] %v1086_v16  ;;  %v1089_v25 = vsub.f32 %v321_v22, %v705_v23  ;;  %v706_v26 = vld [vmem:[%s2231_s17 + $0x398] sm:$0xff]  ;;  %v707_v28 = vld [vmem:[%s2231_s17 + $0x3a0] sm:$0xff]  ;;  %1471 = vst [vmem:[%s2253_s19 + $0x380] sm:$0xff] %v1087_v20 }
  0xa8   : > { %1472 = vst [vmem:[%s2253_s19 + $0x388] sm:$0xff] %v1088_v21  ;;  %v1090_v29 = vsub.f32 %v322_v24, %v706_v26  ;;  %v1091_v30 = vsub.f32 %v323_v27, %v707_v28  ;;  %v324_v31 = vld [vmem:[%s2238_s29 + $0x3a8] sm:$0xff]  ;;  %v325_v33 = vld [vmem:[%s2238_s29 + $0x3b0] sm:$0xff]  ;;  %v326_v36 = vld [vmem:[%s2238_s29 + $0x3b8] sm:$0xff] }
  0xa9   : > { %v708_v32 = vld [vmem:[%s2231_s17 + $0x3a8] sm:$0xff]  ;;  %1473 = vst [vmem:[%s2253_s19 + $0x390] sm:$0xff] %v1089_v25  ;;  %v709_v35 = vld [vmem:[%s2231_s17 + $0x3b0] sm:$0xff]  ;;  %v710_v37 = vld [vmem:[%s2231_s17 + $0x3b8] sm:$0xff] }
  0xaa   : > { %v1092_v34 = vsub.f32 %v324_v31, %v708_v32  ;;  %1474 = vst [vmem:[%s2253_s19 + $0x398] sm:$0xff] %v1090_v29  ;;  %1475 = vst [vmem:[%s2253_s19 + $0x3a0] sm:$0xff] %v1091_v30  ;;  %v1093_v38 = vsub.f32 %v325_v33, %v709_v35  ;;  %v1094_v39 = vsub.f32 %v326_v36, %v710_v37  ;;  %v327_v40 = vld [vmem:[%s2238_s29 + $0x3c0] sm:$0xff]  ;;  %v328_v42 = vld [vmem:[%s2238_s29 + $0x3c8] sm:$0xff] }
  0xab   : > { %v711_v41 = vld [vmem:[%s2231_s17 + $0x3c0] sm:$0xff]  ;;  %v712_v44 = vld [vmem:[%s2231_s17 + $0x3c8] sm:$0xff]  ;;  %v329_v45 = vld [vmem:[%s2238_s29 + $0x3d0] sm:$0xff] }
  0xac   : > { %1476 = vst [vmem:[%s2253_s19 + $0x3a8] sm:$0xff] %v1092_v34  ;;  %v1095_v43 = vsub.f32 %v327_v40, %v711_v41  ;;  %v713_v46 = vld [vmem:[%s2231_s17 + $0x3d0] sm:$0xff]  ;;  %1477 = vst [vmem:[%s2253_s19 + $0x3b0] sm:$0xff] %v1093_v38  ;;  %v1096_v47 = vsub.f32 %v328_v42, %v712_v44  ;;  %v330_v49 = vld [vmem:[%s2238_s29 + $0x3d8] sm:$0xff] }
  0xad   : > { %1478 = vst [vmem:[%s2253_s19 + $0x3b8] sm:$0xff] %v1094_v39  ;;  %v1097_v48 = vsub.f32 %v329_v45, %v713_v46  ;;  %v714_v50 = vld [vmem:[%s2231_s17 + $0x3d8] sm:$0xff]  ;;  %v331_v51 = vld [vmem:[%s2238_s29 + $0x3e0] sm:$0xff]  ;;  %v332_v54 = vld [vmem:[%s2238_s29 + $0x3e8] sm:$0xff] }
  0xae   : > { %1479 = vst [vmem:[%s2253_s19 + $0x3c0] sm:$0xff] %v1095_v43  ;;  %v1098_v52 = vsub.f32 %v330_v49, %v714_v50  ;;  %v715_v53 = vld [vmem:[%s2231_s17 + $0x3e0] sm:$0xff]  ;;  %v716_v55 = vld [vmem:[%s2231_s17 + $0x3e8] sm:$0xff]  ;;  %1480 = vst [vmem:[%s2253_s19 + $0x3c8] sm:$0xff] %v1096_v47 }
  0xaf   : > { %1481 = vst [vmem:[%s2253_s19 + $0x3d0] sm:$0xff] %v1097_v48  ;;  %v1099_v56 = vsub.f32 %v331_v51, %v715_v53  ;;  %v1100_v57 = vsub.f32 %v332_v54, %v716_v55  ;;  %v333_v58 = vld [vmem:[%s2238_s29 + $0x3f0] sm:$0xff]  ;;  %v334_v60 = vld [vmem:[%s2238_s29 + $0x3f8] sm:$0xff]  ;;  %v335_v63 = vld [vmem:[%s2238_s29 + $0x400] sm:$0xff] }
  0xb0   : > { %v717_v59 = vld [vmem:[%s2231_s17 + $0x3f0] sm:$0xff]  ;;  %1482 = vst [vmem:[%s2253_s19 + $0x3d8] sm:$0xff] %v1098_v52  ;;  %v718_v62 = vld [vmem:[%s2231_s17 + $0x3f8] sm:$0xff]  ;;  %v719_v0 = vld [vmem:[%s2231_s17 + $0x400] sm:$0xff] }
  0xb1   : > { %v1101_v61 = vsub.f32 %v333_v58, %v717_v59  ;;  %1483 = vst [vmem:[%s2253_s19 + $0x3e0] sm:$0xff] %v1099_v56  ;;  %1484 = vst [vmem:[%s2253_s19 + $0x3e8] sm:$0xff] %v1100_v57  ;;  %v1102_v1 = vsub.f32 %v334_v60, %v718_v62  ;;  %v1103_v2 = vsub.f32 %v335_v63, %v719_v0  ;;  %v336_v3 = vld [vmem:[%s2238_s29 + $0x408] sm:$0xff]  ;;  %v337_v5 = vld [vmem:[%s2238_s29 + $0x410] sm:$0xff] }
  0xb2   : > { %v720_v4 = vld [vmem:[%s2231_s17 + $0x408] sm:$0xff]  ;;  %v721_v7 = vld [vmem:[%s2231_s17 + $0x410] sm:$0xff]  ;;  %v338_v8 = vld [vmem:[%s2238_s29 + $0x418] sm:$0xff] }
  0xb3   : > { %1485 = vst [vmem:[%s2253_s19 + $0x3f0] sm:$0xff] %v1101_v61  ;;  %v1104_v6 = vsub.f32 %v336_v3, %v720_v4  ;;  %v722_v9 = vld [vmem:[%s2231_s17 + $0x418] sm:$0xff]  ;;  %1486 = vst [vmem:[%s2253_s19 + $0x3f8] sm:$0xff] %v1102_v1  ;;  %v1105_v10 = vsub.f32 %v337_v5, %v721_v7  ;;  %v339_v12 = vld [vmem:[%s2238_s29 + $0x420] sm:$0xff] }
  0xb4   : > { %1487 = vst [vmem:[%s2253_s19 + $0x400] sm:$0xff] %v1103_v2  ;;  %v1106_v11 = vsub.f32 %v338_v8, %v722_v9  ;;  %v723_v13 = vld [vmem:[%s2231_s17 + $0x420] sm:$0xff]  ;;  %v340_v14 = vld [vmem:[%s2238_s29 + $0x428] sm:$0xff]  ;;  %v341_v17 = vld [vmem:[%s2238_s29 + $0x430] sm:$0xff] }
  0xb5   : > { %1488 = vst [vmem:[%s2253_s19 + $0x408] sm:$0xff] %v1104_v6  ;;  %v1107_v15 = vsub.f32 %v339_v12, %v723_v13  ;;  %v724_v16 = vld [vmem:[%s2231_s17 + $0x428] sm:$0xff]  ;;  %v725_v18 = vld [vmem:[%s2231_s17 + $0x430] sm:$0xff]  ;;  %1489 = vst [vmem:[%s2253_s19 + $0x410] sm:$0xff] %v1105_v10 }
  0xb6   : > { %1490 = vst [vmem:[%s2253_s19 + $0x418] sm:$0xff] %v1106_v11  ;;  %v1108_v19 = vsub.f32 %v340_v14, %v724_v16  ;;  %v1109_v20 = vsub.f32 %v341_v17, %v725_v18  ;;  %v342_v21 = vld [vmem:[%s2238_s29 + $0x438] sm:$0xff]  ;;  %v343_v23 = vld [vmem:[%s2238_s29 + $0x440] sm:$0xff]  ;;  %v344_v26 = vld [vmem:[%s2238_s29 + $0x448] sm:$0xff] }
  0xb7   : > { %v726_v22 = vld [vmem:[%s2231_s17 + $0x438] sm:$0xff]  ;;  %1491 = vst [vmem:[%s2253_s19 + $0x420] sm:$0xff] %v1107_v15  ;;  %v727_v25 = vld [vmem:[%s2231_s17 + $0x440] sm:$0xff]  ;;  %v728_v27 = vld [vmem:[%s2231_s17 + $0x448] sm:$0xff] }
  0xb8   : > { %v1110_v24 = vsub.f32 %v342_v21, %v726_v22  ;;  %1492 = vst [vmem:[%s2253_s19 + $0x428] sm:$0xff] %v1108_v19  ;;  %1493 = vst [vmem:[%s2253_s19 + $0x430] sm:$0xff] %v1109_v20  ;;  %v1111_v28 = vsub.f32 %v343_v23, %v727_v25  ;;  %v1112_v29 = vsub.f32 %v344_v26, %v728_v27  ;;  %v345_v30 = vld [vmem:[%s2238_s29 + $0x450] sm:$0xff]  ;;  %v346_v32 = vld [vmem:[%s2238_s29 + $0x458] sm:$0xff] }
  0xb9   : > { %v729_v31 = vld [vmem:[%s2231_s17 + $0x450] sm:$0xff]  ;;  %v730_v34 = vld [vmem:[%s2231_s17 + $0x458] sm:$0xff]  ;;  %v347_v35 = vld [vmem:[%s2238_s29 + $0x460] sm:$0xff] }
  0xba   : > { %1494 = vst [vmem:[%s2253_s19 + $0x438] sm:$0xff] %v1110_v24  ;;  %v1113_v33 = vsub.f32 %v345_v30, %v729_v31  ;;  %v731_v36 = vld [vmem:[%s2231_s17 + $0x460] sm:$0xff]  ;;  %1495 = vst [vmem:[%s2253_s19 + $0x440] sm:$0xff] %v1111_v28  ;;  %v1114_v37 = vsub.f32 %v346_v32, %v730_v34  ;;  %v348_v39 = vld [vmem:[%s2238_s29 + $0x468] sm:$0xff] }
  0xbb   : > { %1496 = vst [vmem:[%s2253_s19 + $0x448] sm:$0xff] %v1112_v29  ;;  %v1115_v38 = vsub.f32 %v347_v35, %v731_v36  ;;  %v732_v40 = vld [vmem:[%s2231_s17 + $0x468] sm:$0xff]  ;;  %v349_v41 = vld [vmem:[%s2238_s29 + $0x470] sm:$0xff]  ;;  %v350_v44 = vld [vmem:[%s2238_s29 + $0x478] sm:$0xff] }
  0xbc   : > { %1497 = vst [vmem:[%s2253_s19 + $0x450] sm:$0xff] %v1113_v33  ;;  %v1116_v42 = vsub.f32 %v348_v39, %v732_v40  ;;  %v733_v43 = vld [vmem:[%s2231_s17 + $0x470] sm:$0xff]  ;;  %v734_v45 = vld [vmem:[%s2231_s17 + $0x478] sm:$0xff]  ;;  %1498 = vst [vmem:[%s2253_s19 + $0x458] sm:$0xff] %v1114_v37 }
  0xbd   : > { %1499 = vst [vmem:[%s2253_s19 + $0x460] sm:$0xff] %v1115_v38  ;;  %v1117_v46 = vsub.f32 %v349_v41, %v733_v43  ;;  %v1118_v47 = vsub.f32 %v350_v44, %v734_v45  ;;  %v351_v48 = vld [vmem:[%s2238_s29 + $0x480] sm:$0xff]  ;;  %v352_v50 = vld [vmem:[%s2238_s29 + $0x488] sm:$0xff]  ;;  %v353_v53 = vld [vmem:[%s2238_s29 + $0x490] sm:$0xff] }
  0xbe   : > { %v735_v49 = vld [vmem:[%s2231_s17 + $0x480] sm:$0xff]  ;;  %1500 = vst [vmem:[%s2253_s19 + $0x468] sm:$0xff] %v1116_v42  ;;  %v736_v52 = vld [vmem:[%s2231_s17 + $0x488] sm:$0xff]  ;;  %v737_v54 = vld [vmem:[%s2231_s17 + $0x490] sm:$0xff] }
  0xbf   : > { %v1119_v51 = vsub.f32 %v351_v48, %v735_v49  ;;  %1501 = vst [vmem:[%s2253_s19 + $0x470] sm:$0xff] %v1117_v46  ;;  %1502 = vst [vmem:[%s2253_s19 + $0x478] sm:$0xff] %v1118_v47  ;;  %v1120_v55 = vsub.f32 %v352_v50, %v736_v52  ;;  %v1121_v56 = vsub.f32 %v353_v53, %v737_v54  ;;  %v354_v57 = vld [vmem:[%s2238_s29 + $0x498] sm:$0xff]  ;;  %v355_v59 = vld [vmem:[%s2238_s29 + $0x4a0] sm:$0xff] }
  0xc0   : > { %v738_v58 = vld [vmem:[%s2231_s17 + $0x498] sm:$0xff]  ;;  %v739_v61 = vld [vmem:[%s2231_s17 + $0x4a0] sm:$0xff]  ;;  %v356_v62 = vld [vmem:[%s2238_s29 + $0x4a8] sm:$0xff] }
  0xc1   : > { %1503 = vst [vmem:[%s2253_s19 + $0x480] sm:$0xff] %v1119_v51  ;;  %v1122_v60 = vsub.f32 %v354_v57, %v738_v58  ;;  %v740_v63 = vld [vmem:[%s2231_s17 + $0x4a8] sm:$0xff]  ;;  %1504 = vst [vmem:[%s2253_s19 + $0x488] sm:$0xff] %v1120_v55  ;;  %v1123_v0 = vsub.f32 %v355_v59, %v739_v61  ;;  %v357_v2 = vld [vmem:[%s2238_s29 + $0x4b0] sm:$0xff] }
  0xc2   : > { %1505 = vst [vmem:[%s2253_s19 + $0x490] sm:$0xff] %v1121_v56  ;;  %v1124_v1 = vsub.f32 %v356_v62, %v740_v63  ;;  %v741_v3 = vld [vmem:[%s2231_s17 + $0x4b0] sm:$0xff]  ;;  %v358_v4 = vld [vmem:[%s2238_s29 + $0x4b8] sm:$0xff]  ;;  %v359_v7 = vld [vmem:[%s2238_s29 + $0x4c0] sm:$0xff] }
  0xc3   : > { %1506 = vst [vmem:[%s2253_s19 + $0x498] sm:$0xff] %v1122_v60  ;;  %v1125_v5 = vsub.f32 %v357_v2, %v741_v3  ;;  %v742_v6 = vld [vmem:[%s2231_s17 + $0x4b8] sm:$0xff]  ;;  %v743_v8 = vld [vmem:[%s2231_s17 + $0x4c0] sm:$0xff]  ;;  %1507 = vst [vmem:[%s2253_s19 + $0x4a0] sm:$0xff] %v1123_v0 }
  0xc4   : > { %1508 = vst [vmem:[%s2253_s19 + $0x4a8] sm:$0xff] %v1124_v1  ;;  %v1126_v9 = vsub.f32 %v358_v4, %v742_v6  ;;  %v1127_v10 = vsub.f32 %v359_v7, %v743_v8  ;;  %v360_v11 = vld [vmem:[%s2238_s29 + $0x4c8] sm:$0xff]  ;;  %v361_v13 = vld [vmem:[%s2238_s29 + $0x4d0] sm:$0xff]  ;;  %v362_v16 = vld [vmem:[%s2238_s29 + $0x4d8] sm:$0xff] }
  0xc5   : > { %v744_v12 = vld [vmem:[%s2231_s17 + $0x4c8] sm:$0xff]  ;;  %1509 = vst [vmem:[%s2253_s19 + $0x4b0] sm:$0xff] %v1125_v5  ;;  %v745_v15 = vld [vmem:[%s2231_s17 + $0x4d0] sm:$0xff]  ;;  %v746_v17 = vld [vmem:[%s2231_s17 + $0x4d8] sm:$0xff] }
  0xc6   : > { %v1128_v14 = vsub.f32 %v360_v11, %v744_v12  ;;  %1510 = vst [vmem:[%s2253_s19 + $0x4b8] sm:$0xff] %v1126_v9  ;;  %1511 = vst [vmem:[%s2253_s19 + $0x4c0] sm:$0xff] %v1127_v10  ;;  %v1129_v18 = vsub.f32 %v361_v13, %v745_v15  ;;  %v1130_v19 = vsub.f32 %v362_v16, %v746_v17  ;;  %v363_v20 = vld [vmem:[%s2238_s29 + $0x4e0] sm:$0xff]  ;;  %v364_v22 = vld [vmem:[%s2238_s29 + $0x4e8] sm:$0xff] }
  0xc7   : > { %v747_v21 = vld [vmem:[%s2231_s17 + $0x4e0] sm:$0xff]  ;;  %v748_v24 = vld [vmem:[%s2231_s17 + $0x4e8] sm:$0xff]  ;;  %v365_v25 = vld [vmem:[%s2238_s29 + $0x4f0] sm:$0xff] }
  0xc8   : > { %1512 = vst [vmem:[%s2253_s19 + $0x4c8] sm:$0xff] %v1128_v14  ;;  %v1131_v23 = vsub.f32 %v363_v20, %v747_v21  ;;  %v749_v26 = vld [vmem:[%s2231_s17 + $0x4f0] sm:$0xff]  ;;  %1513 = vst [vmem:[%s2253_s19 + $0x4d0] sm:$0xff] %v1129_v18  ;;  %v1132_v27 = vsub.f32 %v364_v22, %v748_v24  ;;  %v366_v29 = vld [vmem:[%s2238_s29 + $0x4f8] sm:$0xff] }
  0xc9   : > { %1514 = vst [vmem:[%s2253_s19 + $0x4d8] sm:$0xff] %v1130_v19  ;;  %v1133_v28 = vsub.f32 %v365_v25, %v749_v26  ;;  %v750_v30 = vld [vmem:[%s2231_s17 + $0x4f8] sm:$0xff]  ;;  %v367_v31 = vld [vmem:[%s2238_s29 + $0x500] sm:$0xff]  ;;  %v368_v34 = vld [vmem:[%s2238_s29 + $0x508] sm:$0xff] }
  0xca   : > { %1515 = vst [vmem:[%s2253_s19 + $0x4e0] sm:$0xff] %v1131_v23  ;;  %v1134_v32 = vsub.f32 %v366_v29, %v750_v30  ;;  %v751_v33 = vld [vmem:[%s2231_s17 + $0x500] sm:$0xff]  ;;  %v752_v35 = vld [vmem:[%s2231_s17 + $0x508] sm:$0xff]  ;;  %1516 = vst [vmem:[%s2253_s19 + $0x4e8] sm:$0xff] %v1132_v27 }
  0xcb   : > { %1517 = vst [vmem:[%s2253_s19 + $0x4f0] sm:$0xff] %v1133_v28  ;;  %v1135_v36 = vsub.f32 %v367_v31, %v751_v33  ;;  %v1136_v37 = vsub.f32 %v368_v34, %v752_v35  ;;  %v369_v38 = vld [vmem:[%s2238_s29 + $0x510] sm:$0xff]  ;;  %v370_v40 = vld [vmem:[%s2238_s29 + $0x518] sm:$0xff]  ;;  %v371_v43 = vld [vmem:[%s2238_s29 + $0x520] sm:$0xff] }
  0xcc   : > { %v753_v39 = vld [vmem:[%s2231_s17 + $0x510] sm:$0xff]  ;;  %1518 = vst [vmem:[%s2253_s19 + $0x4f8] sm:$0xff] %v1134_v32  ;;  %v754_v42 = vld [vmem:[%s2231_s17 + $0x518] sm:$0xff]  ;;  %v755_v44 = vld [vmem:[%s2231_s17 + $0x520] sm:$0xff] }
  0xcd   : > { %v1137_v41 = vsub.f32 %v369_v38, %v753_v39  ;;  %1519 = vst [vmem:[%s2253_s19 + $0x500] sm:$0xff] %v1135_v36  ;;  %1520 = vst [vmem:[%s2253_s19 + $0x508] sm:$0xff] %v1136_v37  ;;  %v1138_v45 = vsub.f32 %v370_v40, %v754_v42  ;;  %v1139_v46 = vsub.f32 %v371_v43, %v755_v44  ;;  %v372_v47 = vld [vmem:[%s2238_s29 + $0x528] sm:$0xff]  ;;  %v373_v49 = vld [vmem:[%s2238_s29 + $0x530] sm:$0xff] }
  0xce   : > { %v756_v48 = vld [vmem:[%s2231_s17 + $0x528] sm:$0xff]  ;;  %v757_v51 = vld [vmem:[%s2231_s17 + $0x530] sm:$0xff]  ;;  %v374_v52 = vld [vmem:[%s2238_s29 + $0x538] sm:$0xff] }
  0xcf   : > { %1521 = vst [vmem:[%s2253_s19 + $0x510] sm:$0xff] %v1137_v41  ;;  %v1140_v50 = vsub.f32 %v372_v47, %v756_v48  ;;  %v758_v53 = vld [vmem:[%s2231_s17 + $0x538] sm:$0xff]  ;;  %1522 = vst [vmem:[%s2253_s19 + $0x518] sm:$0xff] %v1138_v45  ;;  %v1141_v54 = vsub.f32 %v373_v49, %v757_v51  ;;  %v375_v56 = vld [vmem:[%s2238_s29 + $0x540] sm:$0xff] }
  0xd0   : > { %1523 = vst [vmem:[%s2253_s19 + $0x520] sm:$0xff] %v1139_v46  ;;  %v1142_v55 = vsub.f32 %v374_v52, %v758_v53  ;;  %v759_v57 = vld [vmem:[%s2231_s17 + $0x540] sm:$0xff]  ;;  %v376_v58 = vld [vmem:[%s2238_s29 + $0x548] sm:$0xff]  ;;  %v377_v61 = vld [vmem:[%s2238_s29 + $0x550] sm:$0xff] }
  0xd1   : > { %1524 = vst [vmem:[%s2253_s19 + $0x528] sm:$0xff] %v1140_v50  ;;  %v1143_v59 = vsub.f32 %v375_v56, %v759_v57  ;;  %v760_v60 = vld [vmem:[%s2231_s17 + $0x548] sm:$0xff]  ;;  %v761_v62 = vld [vmem:[%s2231_s17 + $0x550] sm:$0xff]  ;;  %1525 = vst [vmem:[%s2253_s19 + $0x530] sm:$0xff] %v1141_v54 }
  0xd2   : > { %1526 = vst [vmem:[%s2253_s19 + $0x538] sm:$0xff] %v1142_v55  ;;  %v1144_v63 = vsub.f32 %v376_v58, %v760_v60  ;;  %v1145_v0 = vsub.f32 %v377_v61, %v761_v62  ;;  %v378_v1 = vld [vmem:[%s2238_s29 + $0x558] sm:$0xff]  ;;  %v379_v3 = vld [vmem:[%s2238_s29 + $0x560] sm:$0xff]  ;;  %v380_v6 = vld [vmem:[%s2238_s29 + $0x568] sm:$0xff] }
  0xd3   : > { %v762_v2 = vld [vmem:[%s2231_s17 + $0x558] sm:$0xff]  ;;  %1527 = vst [vmem:[%s2253_s19 + $0x540] sm:$0xff] %v1143_v59  ;;  %v763_v5 = vld [vmem:[%s2231_s17 + $0x560] sm:$0xff]  ;;  %v764_v7 = vld [vmem:[%s2231_s17 + $0x568] sm:$0xff] }
  0xd4   : > { %v1146_v4 = vsub.f32 %v378_v1, %v762_v2  ;;  %1528 = vst [vmem:[%s2253_s19 + $0x548] sm:$0xff] %v1144_v63  ;;  %1529 = vst [vmem:[%s2253_s19 + $0x550] sm:$0xff] %v1145_v0  ;;  %v1147_v8 = vsub.f32 %v379_v3, %v763_v5  ;;  %v1148_v9 = vsub.f32 %v380_v6, %v764_v7  ;;  %v381_v10 = vld [vmem:[%s2238_s29 + $0x570] sm:$0xff]  ;;  %v382_v12 = vld [vmem:[%s2238_s29 + $0x578] sm:$0xff] }
  0xd5   : > { %v765_v11 = vld [vmem:[%s2231_s17 + $0x570] sm:$0xff]  ;;  %v766_v14 = vld [vmem:[%s2231_s17 + $0x578] sm:$0xff]  ;;  %v383_v15 = vld [vmem:[%s2238_s29 + $0x580] sm:$0xff] }
  0xd6   : > { %1530 = vst [vmem:[%s2253_s19 + $0x558] sm:$0xff] %v1146_v4  ;;  %v1149_v13 = vsub.f32 %v381_v10, %v765_v11  ;;  %v767_v16 = vld [vmem:[%s2231_s17 + $0x580] sm:$0xff]  ;;  %1531 = vst [vmem:[%s2253_s19 + $0x560] sm:$0xff] %v1147_v8  ;;  %v1150_v17 = vsub.f32 %v382_v12, %v766_v14  ;;  %v384_v19 = vld [vmem:[%s2238_s29 + $0x588] sm:$0xff] }
  0xd7   : > { %1532 = vst [vmem:[%s2253_s19 + $0x568] sm:$0xff] %v1148_v9  ;;  %v1151_v18 = vsub.f32 %v383_v15, %v767_v16  ;;  %v768_v20 = vld [vmem:[%s2231_s17 + $0x588] sm:$0xff]  ;;  %v385_v21 = vld [vmem:[%s2238_s29 + $0x590] sm:$0xff]  ;;  %v386_v24 = vld [vmem:[%s2238_s29 + $0x598] sm:$0xff] }
  0xd8   : > { %1533 = vst [vmem:[%s2253_s19 + $0x570] sm:$0xff] %v1149_v13  ;;  %v1152_v22 = vsub.f32 %v384_v19, %v768_v20  ;;  %v769_v23 = vld [vmem:[%s2231_s17 + $0x590] sm:$0xff]  ;;  %v770_v25 = vld [vmem:[%s2231_s17 + $0x598] sm:$0xff]  ;;  %1534 = vst [vmem:[%s2253_s19 + $0x578] sm:$0xff] %v1150_v17 }
  0xd9   : > { %1535 = vst [vmem:[%s2253_s19 + $0x580] sm:$0xff] %v1151_v18  ;;  %v1153_v26 = vsub.f32 %v385_v21, %v769_v23  ;;  %v1154_v27 = vsub.f32 %v386_v24, %v770_v25  ;;  %v387_v28 = vld [vmem:[%s2238_s29 + $0x5a0] sm:$0xff]  ;;  %v388_v30 = vld [vmem:[%s2238_s29 + $0x5a8] sm:$0xff]  ;;  %v389_v33 = vld [vmem:[%s2238_s29 + $0x5b0] sm:$0xff] }
  0xda   : > { %v771_v29 = vld [vmem:[%s2231_s17 + $0x5a0] sm:$0xff]  ;;  %1536 = vst [vmem:[%s2253_s19 + $0x588] sm:$0xff] %v1152_v22  ;;  %v772_v32 = vld [vmem:[%s2231_s17 + $0x5a8] sm:$0xff]  ;;  %v773_v34 = vld [vmem:[%s2231_s17 + $0x5b0] sm:$0xff] }
  0xdb   : > { %v1155_v31 = vsub.f32 %v387_v28, %v771_v29  ;;  %1537 = vst [vmem:[%s2253_s19 + $0x590] sm:$0xff] %v1153_v26  ;;  %1538 = vst [vmem:[%s2253_s19 + $0x598] sm:$0xff] %v1154_v27  ;;  %v1156_v35 = vsub.f32 %v388_v30, %v772_v32  ;;  %v1157_v36 = vsub.f32 %v389_v33, %v773_v34  ;;  %v390_v37 = vld [vmem:[%s2238_s29 + $0x5b8] sm:$0xff]  ;;  %v391_v39 = vld [vmem:[%s2238_s29 + $0x5c0] sm:$0xff] }
  0xdc   : > { %v774_v38 = vld [vmem:[%s2231_s17 + $0x5b8] sm:$0xff]  ;;  %v775_v41 = vld [vmem:[%s2231_s17 + $0x5c0] sm:$0xff]  ;;  %v392_v42 = vld [vmem:[%s2238_s29 + $0x5c8] sm:$0xff] }
  0xdd   : > { %1539 = vst [vmem:[%s2253_s19 + $0x5a0] sm:$0xff] %v1155_v31  ;;  %v1158_v40 = vsub.f32 %v390_v37, %v774_v38  ;;  %v776_v43 = vld [vmem:[%s2231_s17 + $0x5c8] sm:$0xff]  ;;  %1540 = vst [vmem:[%s2253_s19 + $0x5a8] sm:$0xff] %v1156_v35  ;;  %v1159_v44 = vsub.f32 %v391_v39, %v775_v41  ;;  %v393_v46 = vld [vmem:[%s2238_s29 + $0x5d0] sm:$0xff] }
  0xde   : > { %1541 = vst [vmem:[%s2253_s19 + $0x5b0] sm:$0xff] %v1157_v36  ;;  %v1160_v45 = vsub.f32 %v392_v42, %v776_v43  ;;  %v777_v47 = vld [vmem:[%s2231_s17 + $0x5d0] sm:$0xff]  ;;  %v394_v48 = vld [vmem:[%s2238_s29 + $0x5d8] sm:$0xff]  ;;  %v395_v51 = vld [vmem:[%s2238_s29 + $0x5e0] sm:$0xff] }
  0xdf   : > { %1542 = vst [vmem:[%s2253_s19 + $0x5b8] sm:$0xff] %v1158_v40  ;;  %v1161_v49 = vsub.f32 %v393_v46, %v777_v47  ;;  %v778_v50 = vld [vmem:[%s2231_s17 + $0x5d8] sm:$0xff]  ;;  %v779_v52 = vld [vmem:[%s2231_s17 + $0x5e0] sm:$0xff]  ;;  %1543 = vst [vmem:[%s2253_s19 + $0x5c0] sm:$0xff] %v1159_v44 }
  0xe0   : > { %1544 = vst [vmem:[%s2253_s19 + $0x5c8] sm:$0xff] %v1160_v45  ;;  %v1162_v53 = vsub.f32 %v394_v48, %v778_v50  ;;  %v1163_v54 = vsub.f32 %v395_v51, %v779_v52  ;;  %v396_v55 = vld [vmem:[%s2238_s29 + $0x5e8] sm:$0xff]  ;;  %v397_v57 = vld [vmem:[%s2238_s29 + $0x5f0] sm:$0xff]  ;;  %v398_v60 = vld [vmem:[%s2238_s29 + $0x5f8] sm:$0xff] }
  0xe1   : > { %v780_v56 = vld [vmem:[%s2231_s17 + $0x5e8] sm:$0xff]  ;;  %1545 = vst [vmem:[%s2253_s19 + $0x5d0] sm:$0xff] %v1161_v49  ;;  %v781_v59 = vld [vmem:[%s2231_s17 + $0x5f0] sm:$0xff]  ;;  %v782_v61 = vld [vmem:[%s2231_s17 + $0x5f8] sm:$0xff] }
  0xe2   : > { %v1164_v58 = vsub.f32 %v396_v55, %v780_v56  ;;  %1546 = vst [vmem:[%s2253_s19 + $0x5d8] sm:$0xff] %v1162_v53  ;;  %1547 = vst [vmem:[%s2253_s19 + $0x5e0] sm:$0xff] %v1163_v54  ;;  %v1165_v62 = vsub.f32 %v397_v57, %v781_v59  ;;  %v1166_v63 = vsub.f32 %v398_v60, %v782_v61  ;;  %v399_v0 = vld [vmem:[%s2238_s29 + $0x600] sm:$0xff]  ;;  %v400_v2 = vld [vmem:[%s2238_s29 + $0x608] sm:$0xff] }
  0xe3   : > { %v783_v1 = vld [vmem:[%s2231_s17 + $0x600] sm:$0xff]  ;;  %v784_v4 = vld [vmem:[%s2231_s17 + $0x608] sm:$0xff]  ;;  %v401_v5 = vld [vmem:[%s2238_s29 + $0x610] sm:$0xff] }
  0xe4   : > { %1548 = vst [vmem:[%s2253_s19 + $0x5e8] sm:$0xff] %v1164_v58  ;;  %v1167_v3 = vsub.f32 %v399_v0, %v783_v1  ;;  %v785_v6 = vld [vmem:[%s2231_s17 + $0x610] sm:$0xff]  ;;  %1549 = vst [vmem:[%s2253_s19 + $0x5f0] sm:$0xff] %v1165_v62  ;;  %v1168_v7 = vsub.f32 %v400_v2, %v784_v4  ;;  %v402_v9 = vld [vmem:[%s2238_s29 + $0x618] sm:$0xff] }
  0xe5   : > { %1550 = vst [vmem:[%s2253_s19 + $0x5f8] sm:$0xff] %v1166_v63  ;;  %v1169_v8 = vsub.f32 %v401_v5, %v785_v6  ;;  %v786_v10 = vld [vmem:[%s2231_s17 + $0x618] sm:$0xff]  ;;  %v403_v11 = vld [vmem:[%s2238_s29 + $0x620] sm:$0xff]  ;;  %v404_v14 = vld [vmem:[%s2238_s29 + $0x628] sm:$0xff] }
  0xe6   : > { %1551 = vst [vmem:[%s2253_s19 + $0x600] sm:$0xff] %v1167_v3  ;;  %v1170_v12 = vsub.f32 %v402_v9, %v786_v10  ;;  %v787_v13 = vld [vmem:[%s2231_s17 + $0x620] sm:$0xff]  ;;  %v788_v15 = vld [vmem:[%s2231_s17 + $0x628] sm:$0xff]  ;;  %1552 = vst [vmem:[%s2253_s19 + $0x608] sm:$0xff] %v1168_v7 }
  0xe7   : > { %1553 = vst [vmem:[%s2253_s19 + $0x610] sm:$0xff] %v1169_v8  ;;  %v1171_v16 = vsub.f32 %v403_v11, %v787_v13  ;;  %v1172_v17 = vsub.f32 %v404_v14, %v788_v15  ;;  %v405_v18 = vld [vmem:[%s2238_s29 + $0x630] sm:$0xff]  ;;  %v406_v20 = vld [vmem:[%s2238_s29 + $0x638] sm:$0xff]  ;;  %v407_v23 = vld [vmem:[%s2238_s29 + $0x640] sm:$0xff] }
  0xe8   : > { %v789_v19 = vld [vmem:[%s2231_s17 + $0x630] sm:$0xff]  ;;  %1554 = vst [vmem:[%s2253_s19 + $0x618] sm:$0xff] %v1170_v12  ;;  %v790_v22 = vld [vmem:[%s2231_s17 + $0x638] sm:$0xff]  ;;  %v791_v24 = vld [vmem:[%s2231_s17 + $0x640] sm:$0xff] }
  0xe9   : > { %v1173_v21 = vsub.f32 %v405_v18, %v789_v19  ;;  %1555 = vst [vmem:[%s2253_s19 + $0x620] sm:$0xff] %v1171_v16  ;;  %1556 = vst [vmem:[%s2253_s19 + $0x628] sm:$0xff] %v1172_v17  ;;  %v1174_v25 = vsub.f32 %v406_v20, %v790_v22  ;;  %v1175_v26 = vsub.f32 %v407_v23, %v791_v24  ;;  %v408_v27 = vld [vmem:[%s2238_s29 + $0x648] sm:$0xff]  ;;  %v409_v29 = vld [vmem:[%s2238_s29 + $0x650] sm:$0xff] }
  0xea   : > { %v792_v28 = vld [vmem:[%s2231_s17 + $0x648] sm:$0xff]  ;;  %v793_v31 = vld [vmem:[%s2231_s17 + $0x650] sm:$0xff]  ;;  %v410_v32 = vld [vmem:[%s2238_s29 + $0x658] sm:$0xff] }
  0xeb   : > { %1557 = vst [vmem:[%s2253_s19 + $0x630] sm:$0xff] %v1173_v21  ;;  %v1176_v30 = vsub.f32 %v408_v27, %v792_v28  ;;  %v794_v33 = vld [vmem:[%s2231_s17 + $0x658] sm:$0xff]  ;;  %1558 = vst [vmem:[%s2253_s19 + $0x638] sm:$0xff] %v1174_v25  ;;  %v1177_v34 = vsub.f32 %v409_v29, %v793_v31  ;;  %v411_v36 = vld [vmem:[%s2238_s29 + $0x660] sm:$0xff] }
  0xec   : > { %1559 = vst [vmem:[%s2253_s19 + $0x640] sm:$0xff] %v1175_v26  ;;  %v1178_v35 = vsub.f32 %v410_v32, %v794_v33  ;;  %v795_v37 = vld [vmem:[%s2231_s17 + $0x660] sm:$0xff]  ;;  %v412_v38 = vld [vmem:[%s2238_s29 + $0x668] sm:$0xff]  ;;  %v413_v41 = vld [vmem:[%s2238_s29 + $0x670] sm:$0xff] }
  0xed   : > { %1560 = vst [vmem:[%s2253_s19 + $0x648] sm:$0xff] %v1176_v30  ;;  %v1179_v39 = vsub.f32 %v411_v36, %v795_v37  ;;  %v796_v40 = vld [vmem:[%s2231_s17 + $0x668] sm:$0xff]  ;;  %v797_v42 = vld [vmem:[%s2231_s17 + $0x670] sm:$0xff]  ;;  %1561 = vst [vmem:[%s2253_s19 + $0x650] sm:$0xff] %v1177_v34 }
  0xee   : > { %1562 = vst [vmem:[%s2253_s19 + $0x658] sm:$0xff] %v1178_v35  ;;  %v1180_v43 = vsub.f32 %v412_v38, %v796_v40  ;;  %v1181_v44 = vsub.f32 %v413_v41, %v797_v42  ;;  %v414_v45 = vld [vmem:[%s2238_s29 + $0x678] sm:$0xff]  ;;  %v415_v47 = vld [vmem:[%s2238_s29 + $0x680] sm:$0xff]  ;;  %v416_v50 = vld [vmem:[%s2238_s29 + $0x688] sm:$0xff] }
  0xef   : > { %v798_v46 = vld [vmem:[%s2231_s17 + $0x678] sm:$0xff]  ;;  %1563 = vst [vmem:[%s2253_s19 + $0x660] sm:$0xff] %v1179_v39  ;;  %v799_v49 = vld [vmem:[%s2231_s17 + $0x680] sm:$0xff]  ;;  %v800_v51 = vld [vmem:[%s2231_s17 + $0x688] sm:$0xff] }
  0xf0   : > { %v1182_v48 = vsub.f32 %v414_v45, %v798_v46  ;;  %1564 = vst [vmem:[%s2253_s19 + $0x668] sm:$0xff] %v1180_v43  ;;  %1565 = vst [vmem:[%s2253_s19 + $0x670] sm:$0xff] %v1181_v44  ;;  %v1183_v52 = vsub.f32 %v415_v47, %v799_v49  ;;  %v1184_v53 = vsub.f32 %v416_v50, %v800_v51  ;;  %v417_v54 = vld [vmem:[%s2238_s29 + $0x690] sm:$0xff]  ;;  %v418_v56 = vld [vmem:[%s2238_s29 + $0x698] sm:$0xff] }
  0xf1   : > { %v801_v55 = vld [vmem:[%s2231_s17 + $0x690] sm:$0xff]  ;;  %v802_v58 = vld [vmem:[%s2231_s17 + $0x698] sm:$0xff]  ;;  %v419_v59 = vld [vmem:[%s2238_s29 + $0x6a0] sm:$0xff] }
  0xf2   : > { %1566 = vst [vmem:[%s2253_s19 + $0x678] sm:$0xff] %v1182_v48  ;;  %v1185_v57 = vsub.f32 %v417_v54, %v801_v55  ;;  %v803_v60 = vld [vmem:[%s2231_s17 + $0x6a0] sm:$0xff]  ;;  %1567 = vst [vmem:[%s2253_s19 + $0x680] sm:$0xff] %v1183_v52  ;;  %v1186_v61 = vsub.f32 %v418_v56, %v802_v58  ;;  %v420_v63 = vld [vmem:[%s2238_s29 + $0x6a8] sm:$0xff] }
  0xf3   : > { %1568 = vst [vmem:[%s2253_s19 + $0x688] sm:$0xff] %v1184_v53  ;;  %v1187_v62 = vsub.f32 %v419_v59, %v803_v60  ;;  %v804_v0 = vld [vmem:[%s2231_s17 + $0x6a8] sm:$0xff]  ;;  %v421_v1 = vld [vmem:[%s2238_s29 + $0x6b0] sm:$0xff]  ;;  %v422_v4 = vld [vmem:[%s2238_s29 + $0x6b8] sm:$0xff] }
  0xf4   : > { %1569 = vst [vmem:[%s2253_s19 + $0x690] sm:$0xff] %v1185_v57  ;;  %v1188_v2 = vsub.f32 %v420_v63, %v804_v0  ;;  %v805_v3 = vld [vmem:[%s2231_s17 + $0x6b0] sm:$0xff]  ;;  %v806_v5 = vld [vmem:[%s2231_s17 + $0x6b8] sm:$0xff]  ;;  %1570 = vst [vmem:[%s2253_s19 + $0x698] sm:$0xff] %v1186_v61 }
  0xf5   : > { %1571 = vst [vmem:[%s2253_s19 + $0x6a0] sm:$0xff] %v1187_v62  ;;  %v1189_v6 = vsub.f32 %v421_v1, %v805_v3  ;;  %v1190_v7 = vsub.f32 %v422_v4, %v806_v5  ;;  %v423_v8 = vld [vmem:[%s2238_s29 + $0x6c0] sm:$0xff]  ;;  %v424_v10 = vld [vmem:[%s2238_s29 + $0x6c8] sm:$0xff]  ;;  %v425_v13 = vld [vmem:[%s2238_s29 + $0x6d0] sm:$0xff] }
  0xf6   : > { %v807_v9 = vld [vmem:[%s2231_s17 + $0x6c0] sm:$0xff]  ;;  %1572 = vst [vmem:[%s2253_s19 + $0x6a8] sm:$0xff] %v1188_v2  ;;  %v808_v12 = vld [vmem:[%s2231_s17 + $0x6c8] sm:$0xff]  ;;  %v809_v14 = vld [vmem:[%s2231_s17 + $0x6d0] sm:$0xff] }
  0xf7   : > { %v1191_v11 = vsub.f32 %v423_v8, %v807_v9  ;;  %1573 = vst [vmem:[%s2253_s19 + $0x6b0] sm:$0xff] %v1189_v6  ;;  %1574 = vst [vmem:[%s2253_s19 + $0x6b8] sm:$0xff] %v1190_v7  ;;  %v1192_v15 = vsub.f32 %v424_v10, %v808_v12  ;;  %v1193_v16 = vsub.f32 %v425_v13, %v809_v14  ;;  %v426_v17 = vld [vmem:[%s2238_s29 + $0x6d8] sm:$0xff]  ;;  %v427_v19 = vld [vmem:[%s2238_s29 + $0x6e0] sm:$0xff] }
  0xf8   : > { %v810_v18 = vld [vmem:[%s2231_s17 + $0x6d8] sm:$0xff]  ;;  %v811_v21 = vld [vmem:[%s2231_s17 + $0x6e0] sm:$0xff]  ;;  %v428_v22 = vld [vmem:[%s2238_s29 + $0x6e8] sm:$0xff] }
  0xf9   : > { %1575 = vst [vmem:[%s2253_s19 + $0x6c0] sm:$0xff] %v1191_v11  ;;  %v1194_v20 = vsub.f32 %v426_v17, %v810_v18  ;;  %v812_v23 = vld [vmem:[%s2231_s17 + $0x6e8] sm:$0xff]  ;;  %1576 = vst [vmem:[%s2253_s19 + $0x6c8] sm:$0xff] %v1192_v15  ;;  %v1195_v24 = vsub.f32 %v427_v19, %v811_v21  ;;  %v429_v26 = vld [vmem:[%s2238_s29 + $0x6f0] sm:$0xff] }
  0xfa   : > { %1577 = vst [vmem:[%s2253_s19 + $0x6d0] sm:$0xff] %v1193_v16  ;;  %v1196_v25 = vsub.f32 %v428_v22, %v812_v23  ;;  %v813_v27 = vld [vmem:[%s2231_s17 + $0x6f0] sm:$0xff]  ;;  %v430_v28 = vld [vmem:[%s2238_s29 + $0x6f8] sm:$0xff]  ;;  %v431_v31 = vld [vmem:[%s2238_s29 + $0x700] sm:$0xff] }
  0xfb   : > { %1578 = vst [vmem:[%s2253_s19 + $0x6d8] sm:$0xff] %v1194_v20  ;;  %v1197_v29 = vsub.f32 %v429_v26, %v813_v27  ;;  %v814_v30 = vld [vmem:[%s2231_s17 + $0x6f8] sm:$0xff]  ;;  %v815_v32 = vld [vmem:[%s2231_s17 + $0x700] sm:$0xff]  ;;  %1579 = vst [vmem:[%s2253_s19 + $0x6e0] sm:$0xff] %v1195_v24 }
  0xfc   : > { %1580 = vst [vmem:[%s2253_s19 + $0x6e8] sm:$0xff] %v1196_v25  ;;  %v1198_v33 = vsub.f32 %v430_v28, %v814_v30  ;;  %v1199_v34 = vsub.f32 %v431_v31, %v815_v32  ;;  %v432_v35 = vld [vmem:[%s2238_s29 + $0x708] sm:$0xff]  ;;  %v433_v37 = vld [vmem:[%s2238_s29 + $0x710] sm:$0xff]  ;;  %v434_v40 = vld [vmem:[%s2238_s29 + $0x718] sm:$0xff] }
  0xfd   : > { %v816_v36 = vld [vmem:[%s2231_s17 + $0x708] sm:$0xff]  ;;  %1581 = vst [vmem:[%s2253_s19 + $0x6f0] sm:$0xff] %v1197_v29  ;;  %v817_v39 = vld [vmem:[%s2231_s17 + $0x710] sm:$0xff]  ;;  %v818_v41 = vld [vmem:[%s2231_s17 + $0x718] sm:$0xff] }
  0xfe   : > { %v1200_v38 = vsub.f32 %v432_v35, %v816_v36  ;;  %1582 = vst [vmem:[%s2253_s19 + $0x6f8] sm:$0xff] %v1198_v33  ;;  %1583 = vst [vmem:[%s2253_s19 + $0x700] sm:$0xff] %v1199_v34  ;;  %v1201_v42 = vsub.f32 %v433_v37, %v817_v39  ;;  %v1202_v43 = vsub.f32 %v434_v40, %v818_v41  ;;  %v435_v44 = vld [vmem:[%s2238_s29 + $0x720] sm:$0xff]  ;;  %v436_v46 = vld [vmem:[%s2238_s29 + $0x728] sm:$0xff] }
  0xff   : > { %v819_v45 = vld [vmem:[%s2231_s17 + $0x720] sm:$0xff]  ;;  %v820_v48 = vld [vmem:[%s2231_s17 + $0x728] sm:$0xff]  ;;  %v437_v49 = vld [vmem:[%s2238_s29 + $0x730] sm:$0xff] }
 0x100   : > { %1584 = vst [vmem:[%s2253_s19 + $0x708] sm:$0xff] %v1200_v38  ;;  %v1203_v47 = vsub.f32 %v435_v44, %v819_v45  ;;  %v821_v50 = vld [vmem:[%s2231_s17 + $0x730] sm:$0xff]  ;;  %1585 = vst [vmem:[%s2253_s19 + $0x710] sm:$0xff] %v1201_v42  ;;  %v1204_v51 = vsub.f32 %v436_v46, %v820_v48  ;;  %v438_v53 = vld [vmem:[%s2238_s29 + $0x738] sm:$0xff] }
 0x101   : > { %1586 = vst [vmem:[%s2253_s19 + $0x718] sm:$0xff] %v1202_v43  ;;  %v1205_v52 = vsub.f32 %v437_v49, %v821_v50  ;;  %v822_v54 = vld [vmem:[%s2231_s17 + $0x738] sm:$0xff]  ;;  %v439_v55 = vld [vmem:[%s2238_s29 + $0x740] sm:$0xff]  ;;  %v440_v58 = vld [vmem:[%s2238_s29 + $0x748] sm:$0xff] }
 0x102   : > { %1587 = vst [vmem:[%s2253_s19 + $0x720] sm:$0xff] %v1203_v47  ;;  %v1206_v56 = vsub.f32 %v438_v53, %v822_v54  ;;  %v823_v57 = vld [vmem:[%s2231_s17 + $0x740] sm:$0xff]  ;;  %v824_v59 = vld [vmem:[%s2231_s17 + $0x748] sm:$0xff]  ;;  %1588 = vst [vmem:[%s2253_s19 + $0x728] sm:$0xff] %v1204_v51 }
 0x103   : > { %1589 = vst [vmem:[%s2253_s19 + $0x730] sm:$0xff] %v1205_v52  ;;  %v1207_v60 = vsub.f32 %v439_v55, %v823_v57  ;;  %v1208_v61 = vsub.f32 %v440_v58, %v824_v59  ;;  %v441_v62 = vld [vmem:[%s2238_s29 + $0x750] sm:$0xff]  ;;  %v442_v0 = vld [vmem:[%s2238_s29 + $0x758] sm:$0xff]  ;;  %v443_v3 = vld [vmem:[%s2238_s29 + $0x760] sm:$0xff] }
 0x104   : > { %v825_v63 = vld [vmem:[%s2231_s17 + $0x750] sm:$0xff]  ;;  %1590 = vst [vmem:[%s2253_s19 + $0x738] sm:$0xff] %v1206_v56  ;;  %v826_v2 = vld [vmem:[%s2231_s17 + $0x758] sm:$0xff]  ;;  %v827_v4 = vld [vmem:[%s2231_s17 + $0x760] sm:$0xff] }
 0x105   : > { %v1209_v1 = vsub.f32 %v441_v62, %v825_v63  ;;  %1591 = vst [vmem:[%s2253_s19 + $0x740] sm:$0xff] %v1207_v60  ;;  %1592 = vst [vmem:[%s2253_s19 + $0x748] sm:$0xff] %v1208_v61  ;;  %v1210_v5 = vsub.f32 %v442_v0, %v826_v2  ;;  %v1211_v6 = vsub.f32 %v443_v3, %v827_v4  ;;  %v444_v7 = vld [vmem:[%s2238_s29 + $0x768] sm:$0xff]  ;;  %v445_v9 = vld [vmem:[%s2238_s29 + $0x770] sm:$0xff] }
 0x106   : > { %v828_v8 = vld [vmem:[%s2231_s17 + $0x768] sm:$0xff]  ;;  %v829_v11 = vld [vmem:[%s2231_s17 + $0x770] sm:$0xff]  ;;  %v446_v12 = vld [vmem:[%s2238_s29 + $0x778] sm:$0xff] }
 0x107   : > { %1593 = vst [vmem:[%s2253_s19 + $0x750] sm:$0xff] %v1209_v1  ;;  %v1212_v10 = vsub.f32 %v444_v7, %v828_v8  ;;  %v830_v13 = vld [vmem:[%s2231_s17 + $0x778] sm:$0xff]  ;;  %1594 = vst [vmem:[%s2253_s19 + $0x758] sm:$0xff] %v1210_v5  ;;  %v1213_v14 = vsub.f32 %v445_v9, %v829_v11  ;;  %v447_v16 = vld [vmem:[%s2238_s29 + $0x780] sm:$0xff] }
 0x108   : > { %1595 = vst [vmem:[%s2253_s19 + $0x760] sm:$0xff] %v1211_v6  ;;  %v1214_v15 = vsub.f32 %v446_v12, %v830_v13  ;;  %v831_v17 = vld [vmem:[%s2231_s17 + $0x780] sm:$0xff]  ;;  %v448_v18 = vld [vmem:[%s2238_s29 + $0x788] sm:$0xff]  ;;  %v449_v21 = vld [vmem:[%s2238_s29 + $0x790] sm:$0xff] }
 0x109   : > { %1596 = vst [vmem:[%s2253_s19 + $0x768] sm:$0xff] %v1212_v10  ;;  %v1215_v19 = vsub.f32 %v447_v16, %v831_v17  ;;  %v832_v20 = vld [vmem:[%s2231_s17 + $0x788] sm:$0xff]  ;;  %v833_v22 = vld [vmem:[%s2231_s17 + $0x790] sm:$0xff]  ;;  %1597 = vst [vmem:[%s2253_s19 + $0x770] sm:$0xff] %v1213_v14 }
 0x10a   : > { %1598 = vst [vmem:[%s2253_s19 + $0x778] sm:$0xff] %v1214_v15  ;;  %v1216_v23 = vsub.f32 %v448_v18, %v832_v20  ;;  %v1217_v24 = vsub.f32 %v449_v21, %v833_v22  ;;  %v450_v25 = vld [vmem:[%s2238_s29 + $0x798] sm:$0xff]  ;;  %v451_v27 = vld [vmem:[%s2238_s29 + $0x7a0] sm:$0xff]  ;;  %v452_v30 = vld [vmem:[%s2238_s29 + $0x7a8] sm:$0xff] }
 0x10b   : > { %v834_v26 = vld [vmem:[%s2231_s17 + $0x798] sm:$0xff]  ;;  %1599 = vst [vmem:[%s2253_s19 + $0x780] sm:$0xff] %v1215_v19  ;;  %v835_v29 = vld [vmem:[%s2231_s17 + $0x7a0] sm:$0xff]  ;;  %v836_v31 = vld [vmem:[%s2231_s17 + $0x7a8] sm:$0xff] }
 0x10c   : > { %v1218_v28 = vsub.f32 %v450_v25, %v834_v26  ;;  %1600 = vst [vmem:[%s2253_s19 + $0x788] sm:$0xff] %v1216_v23  ;;  %1601 = vst [vmem:[%s2253_s19 + $0x790] sm:$0xff] %v1217_v24  ;;  %v1219_v32 = vsub.f32 %v451_v27, %v835_v29  ;;  %v1220_v33 = vsub.f32 %v452_v30, %v836_v31  ;;  %v453_v34 = vld [vmem:[%s2238_s29 + $0x7b0] sm:$0xff]  ;;  %v454_v36 = vld [vmem:[%s2238_s29 + $0x7b8] sm:$0xff] }
 0x10d   : > { %v837_v35 = vld [vmem:[%s2231_s17 + $0x7b0] sm:$0xff]  ;;  %v838_v38 = vld [vmem:[%s2231_s17 + $0x7b8] sm:$0xff]  ;;  %v455_v39 = vld [vmem:[%s2238_s29 + $0x7c0] sm:$0xff] }
 0x10e   : > { %1602 = vst [vmem:[%s2253_s19 + $0x798] sm:$0xff] %v1218_v28  ;;  %v1221_v37 = vsub.f32 %v453_v34, %v837_v35  ;;  %v839_v40 = vld [vmem:[%s2231_s17 + $0x7c0] sm:$0xff]  ;;  %1603 = vst [vmem:[%s2253_s19 + $0x7a0] sm:$0xff] %v1219_v32  ;;  %v1222_v41 = vsub.f32 %v454_v36, %v838_v38  ;;  %v456_v43 = vld [vmem:[%s2238_s29 + $0x7c8] sm:$0xff] }
 0x10f   : > { %1604 = vst [vmem:[%s2253_s19 + $0x7a8] sm:$0xff] %v1220_v33  ;;  %v1223_v42 = vsub.f32 %v455_v39, %v839_v40  ;;  %v840_v44 = vld [vmem:[%s2231_s17 + $0x7c8] sm:$0xff]  ;;  %v457_v45 = vld [vmem:[%s2238_s29 + $0x7d0] sm:$0xff]  ;;  %v458_v48 = vld [vmem:[%s2238_s29 + $0x7d8] sm:$0xff] }
 0x110   : > { %1605 = vst [vmem:[%s2253_s19 + $0x7b0] sm:$0xff] %v1221_v37  ;;  %v1224_v46 = vsub.f32 %v456_v43, %v840_v44  ;;  %v841_v47 = vld [vmem:[%s2231_s17 + $0x7d0] sm:$0xff]  ;;  %v842_v49 = vld [vmem:[%s2231_s17 + $0x7d8] sm:$0xff]  ;;  %1606 = vst [vmem:[%s2253_s19 + $0x7b8] sm:$0xff] %v1222_v41 }
 0x111   : > { %1607 = vst [vmem:[%s2253_s19 + $0x7c0] sm:$0xff] %v1223_v42  ;;  %v1225_v50 = vsub.f32 %v457_v45, %v841_v47  ;;  %v1226_v51 = vsub.f32 %v458_v48, %v842_v49  ;;  %v459_v52 = vld [vmem:[%s2238_s29 + $0x7e0] sm:$0xff]  ;;  %v460_v54 = vld [vmem:[%s2238_s29 + $0x7e8] sm:$0xff]  ;;  %v461_v57 = vld [vmem:[%s2238_s29 + $0x7f0] sm:$0xff] }
 0x112   : > { %v843_v53 = vld [vmem:[%s2231_s17 + $0x7e0] sm:$0xff]  ;;  %1608 = vst [vmem:[%s2253_s19 + $0x7c8] sm:$0xff] %v1224_v46  ;;  %v844_v56 = vld [vmem:[%s2231_s17 + $0x7e8] sm:$0xff]  ;;  %v845_v58 = vld [vmem:[%s2231_s17 + $0x7f0] sm:$0xff] }
 0x113   : > { %v1227_v55 = vsub.f32 %v459_v52, %v843_v53  ;;  %1609 = vst [vmem:[%s2253_s19 + $0x7d0] sm:$0xff] %v1225_v50  ;;  %1610 = vst [vmem:[%s2253_s19 + $0x7d8] sm:$0xff] %v1226_v51  ;;  %v1228_v59 = vsub.f32 %v460_v54, %v844_v56  ;;  %v1229_v60 = vsub.f32 %v461_v57, %v845_v58  ;;  %v462_v61 = vld [vmem:[%s2238_s29 + $0x7f8] sm:$0xff]  ;;  %v463_v63 = vld [vmem:[%s2238_s29 + $0x800] sm:$0xff] }
 0x114   : > { %v846_v62 = vld [vmem:[%s2231_s17 + $0x7f8] sm:$0xff]  ;;  %v847_v1 = vld [vmem:[%s2231_s17 + $0x800] sm:$0xff]  ;;  %v464_v2 = vld [vmem:[%s2238_s29 + $0x808] sm:$0xff] }
 0x115   : > { %1611 = vst [vmem:[%s2253_s19 + $0x7e0] sm:$0xff] %v1227_v55  ;;  %v1230_v0 = vsub.f32 %v462_v61, %v846_v62  ;;  %v848_v3 = vld [vmem:[%s2231_s17 + $0x808] sm:$0xff]  ;;  %1612 = vst [vmem:[%s2253_s19 + $0x7e8] sm:$0xff] %v1228_v59  ;;  %v1231_v4 = vsub.f32 %v463_v63, %v847_v1  ;;  %v465_v6 = vld [vmem:[%s2238_s29 + $0x810] sm:$0xff] }
 0x116   : > { %1613 = vst [vmem:[%s2253_s19 + $0x7f0] sm:$0xff] %v1229_v60  ;;  %v1232_v5 = vsub.f32 %v464_v2, %v848_v3  ;;  %v849_v7 = vld [vmem:[%s2231_s17 + $0x810] sm:$0xff]  ;;  %v466_v8 = vld [vmem:[%s2238_s29 + $0x818] sm:$0xff]  ;;  %v467_v11 = vld [vmem:[%s2238_s29 + $0x820] sm:$0xff] }
 0x117   : > { %1614 = vst [vmem:[%s2253_s19 + $0x7f8] sm:$0xff] %v1230_v0  ;;  %v1233_v9 = vsub.f32 %v465_v6, %v849_v7  ;;  %v850_v10 = vld [vmem:[%s2231_s17 + $0x818] sm:$0xff]  ;;  %v851_v12 = vld [vmem:[%s2231_s17 + $0x820] sm:$0xff]  ;;  %1615 = vst [vmem:[%s2253_s19 + $0x800] sm:$0xff] %v1231_v4 }
 0x118   : > { %1616 = vst [vmem:[%s2253_s19 + $0x808] sm:$0xff] %v1232_v5  ;;  %v1234_v13 = vsub.f32 %v466_v8, %v850_v10  ;;  %v1235_v14 = vsub.f32 %v467_v11, %v851_v12  ;;  %v468_v15 = vld [vmem:[%s2238_s29 + $0x828] sm:$0xff]  ;;  %v469_v17 = vld [vmem:[%s2238_s29 + $0x830] sm:$0xff]  ;;  %v470_v20 = vld [vmem:[%s2238_s29 + $0x838] sm:$0xff] }
 0x119   : > { %v852_v16 = vld [vmem:[%s2231_s17 + $0x828] sm:$0xff]  ;;  %1617 = vst [vmem:[%s2253_s19 + $0x810] sm:$0xff] %v1233_v9  ;;  %v853_v19 = vld [vmem:[%s2231_s17 + $0x830] sm:$0xff]  ;;  %v854_v21 = vld [vmem:[%s2231_s17 + $0x838] sm:$0xff] }
 0x11a   : > { %v1236_v18 = vsub.f32 %v468_v15, %v852_v16  ;;  %1618 = vst [vmem:[%s2253_s19 + $0x818] sm:$0xff] %v1234_v13  ;;  %1619 = vst [vmem:[%s2253_s19 + $0x820] sm:$0xff] %v1235_v14  ;;  %v1237_v22 = vsub.f32 %v469_v17, %v853_v19  ;;  %v1238_v23 = vsub.f32 %v470_v20, %v854_v21  ;;  %v471_v24 = vld [vmem:[%s2238_s29 + $0x840] sm:$0xff]  ;;  %v472_v26 = vld [vmem:[%s2238_s29 + $0x848] sm:$0xff] }
 0x11b   : > { %v855_v25 = vld [vmem:[%s2231_s17 + $0x840] sm:$0xff]  ;;  %v856_v28 = vld [vmem:[%s2231_s17 + $0x848] sm:$0xff]  ;;  %v473_v29 = vld [vmem:[%s2238_s29 + $0x850] sm:$0xff] }
 0x11c   : > { %1620 = vst [vmem:[%s2253_s19 + $0x828] sm:$0xff] %v1236_v18  ;;  %v1239_v27 = vsub.f32 %v471_v24, %v855_v25  ;;  %v857_v30 = vld [vmem:[%s2231_s17 + $0x850] sm:$0xff]  ;;  %1621 = vst [vmem:[%s2253_s19 + $0x830] sm:$0xff] %v1237_v22  ;;  %v1240_v31 = vsub.f32 %v472_v26, %v856_v28  ;;  %v474_v33 = vld [vmem:[%s2238_s29 + $0x858] sm:$0xff] }
 0x11d   : > { %1622 = vst [vmem:[%s2253_s19 + $0x838] sm:$0xff] %v1238_v23  ;;  %v1241_v32 = vsub.f32 %v473_v29, %v857_v30  ;;  %v858_v34 = vld [vmem:[%s2231_s17 + $0x858] sm:$0xff]  ;;  %v475_v35 = vld [vmem:[%s2238_s29 + $0x860] sm:$0xff]  ;;  %v476_v38 = vld [vmem:[%s2238_s29 + $0x868] sm:$0xff] }
 0x11e   : > { %1623 = vst [vmem:[%s2253_s19 + $0x840] sm:$0xff] %v1239_v27  ;;  %v1242_v36 = vsub.f32 %v474_v33, %v858_v34  ;;  %v859_v37 = vld [vmem:[%s2231_s17 + $0x860] sm:$0xff]  ;;  %v860_v39 = vld [vmem:[%s2231_s17 + $0x868] sm:$0xff]  ;;  %1624 = vst [vmem:[%s2253_s19 + $0x848] sm:$0xff] %v1240_v31 }
 0x11f   : > { %1625 = vst [vmem:[%s2253_s19 + $0x850] sm:$0xff] %v1241_v32  ;;  %v1243_v40 = vsub.f32 %v475_v35, %v859_v37  ;;  %v1244_v41 = vsub.f32 %v476_v38, %v860_v39  ;;  %v477_v42 = vld [vmem:[%s2238_s29 + $0x870] sm:$0xff]  ;;  %v478_v44 = vld [vmem:[%s2238_s29 + $0x878] sm:$0xff]  ;;  %v479_v47 = vld [vmem:[%s2238_s29 + $0x880] sm:$0xff] }
 0x120   : > { %v861_v43 = vld [vmem:[%s2231_s17 + $0x870] sm:$0xff]  ;;  %1626 = vst [vmem:[%s2253_s19 + $0x858] sm:$0xff] %v1242_v36  ;;  %v862_v46 = vld [vmem:[%s2231_s17 + $0x878] sm:$0xff]  ;;  %v863_v48 = vld [vmem:[%s2231_s17 + $0x880] sm:$0xff] }
 0x121   : > { %v1245_v45 = vsub.f32 %v477_v42, %v861_v43  ;;  %1627 = vst [vmem:[%s2253_s19 + $0x860] sm:$0xff] %v1243_v40  ;;  %1628 = vst [vmem:[%s2253_s19 + $0x868] sm:$0xff] %v1244_v41  ;;  %v1246_v49 = vsub.f32 %v478_v44, %v862_v46  ;;  %v1247_v50 = vsub.f32 %v479_v47, %v863_v48  ;;  %v480_v51 = vld [vmem:[%s2238_s29 + $0x888] sm:$0xff]  ;;  %v481_v53 = vld [vmem:[%s2238_s29 + $0x890] sm:$0xff] }
 0x122   : > { %v864_v52 = vld [vmem:[%s2231_s17 + $0x888] sm:$0xff]  ;;  %v865_v55 = vld [vmem:[%s2231_s17 + $0x890] sm:$0xff]  ;;  %v482_v56 = vld [vmem:[%s2238_s29 + $0x898] sm:$0xff] }
 0x123   : > { %1629 = vst [vmem:[%s2253_s19 + $0x870] sm:$0xff] %v1245_v45  ;;  %v1248_v54 = vsub.f32 %v480_v51, %v864_v52  ;;  %v866_v57 = vld [vmem:[%s2231_s17 + $0x898] sm:$0xff]  ;;  %1630 = vst [vmem:[%s2253_s19 + $0x878] sm:$0xff] %v1246_v49  ;;  %v1249_v58 = vsub.f32 %v481_v53, %v865_v55  ;;  %v483_v60 = vld [vmem:[%s2238_s29 + $0x8a0] sm:$0xff] }
 0x124   : > { %1631 = vst [vmem:[%s2253_s19 + $0x880] sm:$0xff] %v1247_v50  ;;  %v1250_v59 = vsub.f32 %v482_v56, %v866_v57  ;;  %v867_v61 = vld [vmem:[%s2231_s17 + $0x8a0] sm:$0xff]  ;;  %v484_v62 = vld [vmem:[%s2238_s29 + $0x8a8] sm:$0xff]  ;;  %v485_v1 = vld [vmem:[%s2238_s29 + $0x8b0] sm:$0xff] }
 0x125   : > { %1632 = vst [vmem:[%s2253_s19 + $0x888] sm:$0xff] %v1248_v54  ;;  %v1251_v63 = vsub.f32 %v483_v60, %v867_v61  ;;  %v868_v0 = vld [vmem:[%s2231_s17 + $0x8a8] sm:$0xff]  ;;  %v869_v2 = vld [vmem:[%s2231_s17 + $0x8b0] sm:$0xff]  ;;  %1633 = vst [vmem:[%s2253_s19 + $0x890] sm:$0xff] %v1249_v58 }
 0x126   : > { %1634 = vst [vmem:[%s2253_s19 + $0x898] sm:$0xff] %v1250_v59  ;;  %v1252_v3 = vsub.f32 %v484_v62, %v868_v0  ;;  %v1253_v4 = vsub.f32 %v485_v1, %v869_v2  ;;  %v486_v5 = vld [vmem:[%s2238_s29 + $0x8b8] sm:$0xff]  ;;  %v487_v7 = vld [vmem:[%s2238_s29 + $0x8c0] sm:$0xff]  ;;  %v488_v10 = vld [vmem:[%s2238_s29 + $0x8c8] sm:$0xff] }
 0x127   : > { %v870_v6 = vld [vmem:[%s2231_s17 + $0x8b8] sm:$0xff]  ;;  %1635 = vst [vmem:[%s2253_s19 + $0x8a0] sm:$0xff] %v1251_v63  ;;  %v871_v9 = vld [vmem:[%s2231_s17 + $0x8c0] sm:$0xff]  ;;  %v872_v11 = vld [vmem:[%s2231_s17 + $0x8c8] sm:$0xff] }
 0x128   : > { %v1254_v8 = vsub.f32 %v486_v5, %v870_v6  ;;  %1636 = vst [vmem:[%s2253_s19 + $0x8a8] sm:$0xff] %v1252_v3  ;;  %1637 = vst [vmem:[%s2253_s19 + $0x8b0] sm:$0xff] %v1253_v4  ;;  %v1255_v12 = vsub.f32 %v487_v7, %v871_v9  ;;  %v1256_v13 = vsub.f32 %v488_v10, %v872_v11  ;;  %v489_v14 = vld [vmem:[%s2238_s29 + $0x8d0] sm:$0xff]  ;;  %v490_v16 = vld [vmem:[%s2238_s29 + $0x8d8] sm:$0xff] }
 0x129   : > { %v873_v15 = vld [vmem:[%s2231_s17 + $0x8d0] sm:$0xff]  ;;  %v874_v18 = vld [vmem:[%s2231_s17 + $0x8d8] sm:$0xff]  ;;  %v491_v19 = vld [vmem:[%s2238_s29 + $0x8e0] sm:$0xff] }
 0x12a   : > { %1638 = vst [vmem:[%s2253_s19 + $0x8b8] sm:$0xff] %v1254_v8  ;;  %v1257_v17 = vsub.f32 %v489_v14, %v873_v15  ;;  %v875_v20 = vld [vmem:[%s2231_s17 + $0x8e0] sm:$0xff]  ;;  %1639 = vst [vmem:[%s2253_s19 + $0x8c0] sm:$0xff] %v1255_v12  ;;  %v1258_v21 = vsub.f32 %v490_v16, %v874_v18  ;;  %v492_v23 = vld [vmem:[%s2238_s29 + $0x8e8] sm:$0xff] }
 0x12b   : > { %1640 = vst [vmem:[%s2253_s19 + $0x8c8] sm:$0xff] %v1256_v13  ;;  %v1259_v22 = vsub.f32 %v491_v19, %v875_v20  ;;  %v876_v24 = vld [vmem:[%s2231_s17 + $0x8e8] sm:$0xff]  ;;  %v493_v25 = vld [vmem:[%s2238_s29 + $0x8f0] sm:$0xff]  ;;  %v494_v28 = vld [vmem:[%s2238_s29 + $0x8f8] sm:$0xff] }
 0x12c   : > { %1641 = vst [vmem:[%s2253_s19 + $0x8d0] sm:$0xff] %v1257_v17  ;;  %v1260_v26 = vsub.f32 %v492_v23, %v876_v24  ;;  %v877_v27 = vld [vmem:[%s2231_s17 + $0x8f0] sm:$0xff]  ;;  %v878_v29 = vld [vmem:[%s2231_s17 + $0x8f8] sm:$0xff]  ;;  %1642 = vst [vmem:[%s2253_s19 + $0x8d8] sm:$0xff] %v1258_v21 }
 0x12d   : > { %1643 = vst [vmem:[%s2253_s19 + $0x8e0] sm:$0xff] %v1259_v22  ;;  %v1261_v30 = vsub.f32 %v493_v25, %v877_v27  ;;  %v1262_v31 = vsub.f32 %v494_v28, %v878_v29  ;;  %v495_v32 = vld [vmem:[%s2238_s29 + $0x900] sm:$0xff]  ;;  %v496_v34 = vld [vmem:[%s2238_s29 + $0x908] sm:$0xff]  ;;  %v497_v37 = vld [vmem:[%s2238_s29 + $0x910] sm:$0xff] }
 0x12e   : > { %v879_v33 = vld [vmem:[%s2231_s17 + $0x900] sm:$0xff]  ;;  %1644 = vst [vmem:[%s2253_s19 + $0x8e8] sm:$0xff] %v1260_v26  ;;  %v880_v36 = vld [vmem:[%s2231_s17 + $0x908] sm:$0xff]  ;;  %v881_v38 = vld [vmem:[%s2231_s17 + $0x910] sm:$0xff] }
 0x12f   : > { %v1263_v35 = vsub.f32 %v495_v32, %v879_v33  ;;  %1645 = vst [vmem:[%s2253_s19 + $0x8f0] sm:$0xff] %v1261_v30  ;;  %1646 = vst [vmem:[%s2253_s19 + $0x8f8] sm:$0xff] %v1262_v31  ;;  %v1264_v39 = vsub.f32 %v496_v34, %v880_v36  ;;  %v1265_v40 = vsub.f32 %v497_v37, %v881_v38  ;;  %v498_v41 = vld [vmem:[%s2238_s29 + $0x918] sm:$0xff]  ;;  %v499_v43 = vld [vmem:[%s2238_s29 + $0x920] sm:$0xff] }
 0x130   : > { %v882_v42 = vld [vmem:[%s2231_s17 + $0x918] sm:$0xff]  ;;  %v883_v45 = vld [vmem:[%s2231_s17 + $0x920] sm:$0xff]  ;;  %v500_v46 = vld [vmem:[%s2238_s29 + $0x928] sm:$0xff] }
 0x131   : > { %1647 = vst [vmem:[%s2253_s19 + $0x900] sm:$0xff] %v1263_v35  ;;  %v1266_v44 = vsub.f32 %v498_v41, %v882_v42  ;;  %v884_v47 = vld [vmem:[%s2231_s17 + $0x928] sm:$0xff]  ;;  %1648 = vst [vmem:[%s2253_s19 + $0x908] sm:$0xff] %v1264_v39  ;;  %v1267_v48 = vsub.f32 %v499_v43, %v883_v45  ;;  %v501_v50 = vld [vmem:[%s2238_s29 + $0x930] sm:$0xff] }
 0x132   : > { %1649 = vst [vmem:[%s2253_s19 + $0x910] sm:$0xff] %v1265_v40  ;;  %v1268_v49 = vsub.f32 %v500_v46, %v884_v47  ;;  %v885_v51 = vld [vmem:[%s2231_s17 + $0x930] sm:$0xff]  ;;  %v502_v52 = vld [vmem:[%s2238_s29 + $0x938] sm:$0xff]  ;;  %v503_v55 = vld [vmem:[%s2238_s29 + $0x940] sm:$0xff] }
 0x133   : > { %1650 = vst [vmem:[%s2253_s19 + $0x918] sm:$0xff] %v1266_v44  ;;  %v1269_v53 = vsub.f32 %v501_v50, %v885_v51  ;;  %v886_v54 = vld [vmem:[%s2231_s17 + $0x938] sm:$0xff]  ;;  %v887_v56 = vld [vmem:[%s2231_s17 + $0x940] sm:$0xff]  ;;  %1651 = vst [vmem:[%s2253_s19 + $0x920] sm:$0xff] %v1267_v48 }
 0x134   : > { %1652 = vst [vmem:[%s2253_s19 + $0x928] sm:$0xff] %v1268_v49  ;;  %v1270_v57 = vsub.f32 %v502_v52, %v886_v54  ;;  %v1271_v58 = vsub.f32 %v503_v55, %v887_v56  ;;  %v504_v59 = vld [vmem:[%s2238_s29 + $0x948] sm:$0xff]  ;;  %v505_v61 = vld [vmem:[%s2238_s29 + $0x950] sm:$0xff]  ;;  %v506_v0 = vld [vmem:[%s2238_s29 + $0x958] sm:$0xff] }
 0x135   : > { %v888_v60 = vld [vmem:[%s2231_s17 + $0x948] sm:$0xff]  ;;  %1653 = vst [vmem:[%s2253_s19 + $0x930] sm:$0xff] %v1269_v53  ;;  %v889_v63 = vld [vmem:[%s2231_s17 + $0x950] sm:$0xff]  ;;  %v890_v1 = vld [vmem:[%s2231_s17 + $0x958] sm:$0xff] }
 0x136   : > { %v1272_v62 = vsub.f32 %v504_v59, %v888_v60  ;;  %1654 = vst [vmem:[%s2253_s19 + $0x938] sm:$0xff] %v1270_v57  ;;  %1655 = vst [vmem:[%s2253_s19 + $0x940] sm:$0xff] %v1271_v58  ;;  %v1273_v2 = vsub.f32 %v505_v61, %v889_v63  ;;  %v1274_v3 = vsub.f32 %v506_v0, %v890_v1  ;;  %v507_v4 = vld [vmem:[%s2238_s29 + $0x960] sm:$0xff]  ;;  %v508_v6 = vld [vmem:[%s2238_s29 + $0x968] sm:$0xff] }
 0x137   : > { %v891_v5 = vld [vmem:[%s2231_s17 + $0x960] sm:$0xff]  ;;  %v892_v8 = vld [vmem:[%s2231_s17 + $0x968] sm:$0xff]  ;;  %v509_v9 = vld [vmem:[%s2238_s29 + $0x970] sm:$0xff] }
 0x138   : > { %1656 = vst [vmem:[%s2253_s19 + $0x948] sm:$0xff] %v1272_v62  ;;  %v1275_v7 = vsub.f32 %v507_v4, %v891_v5  ;;  %v893_v10 = vld [vmem:[%s2231_s17 + $0x970] sm:$0xff]  ;;  %1657 = vst [vmem:[%s2253_s19 + $0x950] sm:$0xff] %v1273_v2  ;;  %v1276_v11 = vsub.f32 %v508_v6, %v892_v8  ;;  %v510_v13 = vld [vmem:[%s2238_s29 + $0x978] sm:$0xff] }
 0x139   : > { %1658 = vst [vmem:[%s2253_s19 + $0x958] sm:$0xff] %v1274_v3  ;;  %v1277_v12 = vsub.f32 %v509_v9, %v893_v10  ;;  %v894_v14 = vld [vmem:[%s2231_s17 + $0x978] sm:$0xff]  ;;  %v511_v15 = vld [vmem:[%s2238_s29 + $0x980] sm:$0xff]  ;;  %v512_v18 = vld [vmem:[%s2238_s29 + $0x988] sm:$0xff] }
 0x13a   : > { %1659 = vst [vmem:[%s2253_s19 + $0x960] sm:$0xff] %v1275_v7  ;;  %v1278_v16 = vsub.f32 %v510_v13, %v894_v14  ;;  %v895_v17 = vld [vmem:[%s2231_s17 + $0x980] sm:$0xff]  ;;  %v896_v19 = vld [vmem:[%s2231_s17 + $0x988] sm:$0xff]  ;;  %1660 = vst [vmem:[%s2253_s19 + $0x968] sm:$0xff] %v1276_v11 }
 0x13b   : > { %1661 = vst [vmem:[%s2253_s19 + $0x970] sm:$0xff] %v1277_v12  ;;  %v1279_v20 = vsub.f32 %v511_v15, %v895_v17  ;;  %v1280_v21 = vsub.f32 %v512_v18, %v896_v19  ;;  %v513_v22 = vld [vmem:[%s2238_s29 + $0x990] sm:$0xff]  ;;  %v514_v24 = vld [vmem:[%s2238_s29 + $0x998] sm:$0xff]  ;;  %v515_v27 = vld [vmem:[%s2238_s29 + $0x9a0] sm:$0xff] }
 0x13c   : > { %v897_v23 = vld [vmem:[%s2231_s17 + $0x990] sm:$0xff]  ;;  %1662 = vst [vmem:[%s2253_s19 + $0x978] sm:$0xff] %v1278_v16  ;;  %v898_v26 = vld [vmem:[%s2231_s17 + $0x998] sm:$0xff]  ;;  %v899_v28 = vld [vmem:[%s2231_s17 + $0x9a0] sm:$0xff] }
 0x13d   : > { %v1281_v25 = vsub.f32 %v513_v22, %v897_v23  ;;  %1663 = vst [vmem:[%s2253_s19 + $0x980] sm:$0xff] %v1279_v20  ;;  %1664 = vst [vmem:[%s2253_s19 + $0x988] sm:$0xff] %v1280_v21  ;;  %v1282_v29 = vsub.f32 %v514_v24, %v898_v26  ;;  %v1283_v30 = vsub.f32 %v515_v27, %v899_v28  ;;  %v516_v31 = vld [vmem:[%s2238_s29 + $0x9a8] sm:$0xff]  ;;  %v517_v33 = vld [vmem:[%s2238_s29 + $0x9b0] sm:$0xff] }
 0x13e   : > { %v900_v32 = vld [vmem:[%s2231_s17 + $0x9a8] sm:$0xff]  ;;  %v901_v35 = vld [vmem:[%s2231_s17 + $0x9b0] sm:$0xff]  ;;  %v518_v36 = vld [vmem:[%s2238_s29 + $0x9b8] sm:$0xff] }
 0x13f   : > { %1665 = vst [vmem:[%s2253_s19 + $0x990] sm:$0xff] %v1281_v25  ;;  %v1284_v34 = vsub.f32 %v516_v31, %v900_v32  ;;  %v902_v37 = vld [vmem:[%s2231_s17 + $0x9b8] sm:$0xff]  ;;  %1666 = vst [vmem:[%s2253_s19 + $0x998] sm:$0xff] %v1282_v29  ;;  %v1285_v38 = vsub.f32 %v517_v33, %v901_v35  ;;  %v519_v40 = vld [vmem:[%s2238_s29 + $0x9c0] sm:$0xff] }
 0x140   : > { %1667 = vst [vmem:[%s2253_s19 + $0x9a0] sm:$0xff] %v1283_v30  ;;  %v1286_v39 = vsub.f32 %v518_v36, %v902_v37  ;;  %v903_v41 = vld [vmem:[%s2231_s17 + $0x9c0] sm:$0xff]  ;;  %v520_v42 = vld [vmem:[%s2238_s29 + $0x9c8] sm:$0xff]  ;;  %v521_v45 = vld [vmem:[%s2238_s29 + $0x9d0] sm:$0xff] }
 0x141   : > { %1668 = vst [vmem:[%s2253_s19 + $0x9a8] sm:$0xff] %v1284_v34  ;;  %v1287_v43 = vsub.f32 %v519_v40, %v903_v41  ;;  %v904_v44 = vld [vmem:[%s2231_s17 + $0x9c8] sm:$0xff]  ;;  %v905_v46 = vld [vmem:[%s2231_s17 + $0x9d0] sm:$0xff]  ;;  %1669 = vst [vmem:[%s2253_s19 + $0x9b0] sm:$0xff] %v1285_v38 }
 0x142   : > { %1670 = vst [vmem:[%s2253_s19 + $0x9b8] sm:$0xff] %v1286_v39  ;;  %v1288_v47 = vsub.f32 %v520_v42, %v904_v44  ;;  %v1289_v48 = vsub.f32 %v521_v45, %v905_v46  ;;  %v522_v49 = vld [vmem:[%s2238_s29 + $0x9d8] sm:$0xff]  ;;  %v523_v51 = vld [vmem:[%s2238_s29 + $0x9e0] sm:$0xff]  ;;  %v524_v54 = vld [vmem:[%s2238_s29 + $0x9e8] sm:$0xff] }
 0x143   : > { %v906_v50 = vld [vmem:[%s2231_s17 + $0x9d8] sm:$0xff]  ;;  %1671 = vst [vmem:[%s2253_s19 + $0x9c0] sm:$0xff] %v1287_v43  ;;  %v907_v53 = vld [vmem:[%s2231_s17 + $0x9e0] sm:$0xff]  ;;  %v908_v55 = vld [vmem:[%s2231_s17 + $0x9e8] sm:$0xff] }
 0x144   : > { %v1290_v52 = vsub.f32 %v522_v49, %v906_v50  ;;  %1672 = vst [vmem:[%s2253_s19 + $0x9c8] sm:$0xff] %v1288_v47  ;;  %1673 = vst [vmem:[%s2253_s19 + $0x9d0] sm:$0xff] %v1289_v48  ;;  %v1291_v56 = vsub.f32 %v523_v51, %v907_v53  ;;  %v1292_v57 = vsub.f32 %v524_v54, %v908_v55  ;;  %v525_v58 = vld [vmem:[%s2238_s29 + $0x9f0] sm:$0xff]  ;;  %v526_v60 = vld [vmem:[%s2238_s29 + $0x9f8] sm:$0xff] }
 0x145   : > { %v909_v59 = vld [vmem:[%s2231_s17 + $0x9f0] sm:$0xff]  ;;  %v910_v62 = vld [vmem:[%s2231_s17 + $0x9f8] sm:$0xff]  ;;  %v527_v63 = vld [vmem:[%s2238_s29 + $0xa00] sm:$0xff] }
 0x146   : > { %1674 = vst [vmem:[%s2253_s19 + $0x9d8] sm:$0xff] %v1290_v52  ;;  %v1293_v61 = vsub.f32 %v525_v58, %v909_v59  ;;  %v911_v0 = vld [vmem:[%s2231_s17 + $0xa00] sm:$0xff]  ;;  %1675 = vst [vmem:[%s2253_s19 + $0x9e0] sm:$0xff] %v1291_v56  ;;  %v1294_v1 = vsub.f32 %v526_v60, %v910_v62  ;;  %v528_v3 = vld [vmem:[%s2238_s29 + $0xa08] sm:$0xff] }
 0x147   : > { %1676 = vst [vmem:[%s2253_s19 + $0x9e8] sm:$0xff] %v1292_v57  ;;  %v1295_v2 = vsub.f32 %v527_v63, %v911_v0  ;;  %v912_v4 = vld [vmem:[%s2231_s17 + $0xa08] sm:$0xff]  ;;  %v529_v5 = vld [vmem:[%s2238_s29 + $0xa10] sm:$0xff]  ;;  %v530_v8 = vld [vmem:[%s2238_s29 + $0xa18] sm:$0xff] }
 0x148   : > { %1677 = vst [vmem:[%s2253_s19 + $0x9f0] sm:$0xff] %v1293_v61  ;;  %v1296_v6 = vsub.f32 %v528_v3, %v912_v4  ;;  %v913_v7 = vld [vmem:[%s2231_s17 + $0xa10] sm:$0xff]  ;;  %v914_v9 = vld [vmem:[%s2231_s17 + $0xa18] sm:$0xff]  ;;  %1678 = vst [vmem:[%s2253_s19 + $0x9f8] sm:$0xff] %v1294_v1 }
 0x149   : > { %1679 = vst [vmem:[%s2253_s19 + $0xa00] sm:$0xff] %v1295_v2  ;;  %v1297_v10 = vsub.f32 %v529_v5, %v913_v7  ;;  %v1298_v11 = vsub.f32 %v530_v8, %v914_v9  ;;  %v531_v12 = vld [vmem:[%s2238_s29 + $0xa20] sm:$0xff]  ;;  %v532_v14 = vld [vmem:[%s2238_s29 + $0xa28] sm:$0xff]  ;;  %v533_v17 = vld [vmem:[%s2238_s29 + $0xa30] sm:$0xff] }
 0x14a   : > { %v915_v13 = vld [vmem:[%s2231_s17 + $0xa20] sm:$0xff]  ;;  %1680 = vst [vmem:[%s2253_s19 + $0xa08] sm:$0xff] %v1296_v6  ;;  %v916_v16 = vld [vmem:[%s2231_s17 + $0xa28] sm:$0xff]  ;;  %v917_v18 = vld [vmem:[%s2231_s17 + $0xa30] sm:$0xff] }
 0x14b   : > { %v1299_v15 = vsub.f32 %v531_v12, %v915_v13  ;;  %1681 = vst [vmem:[%s2253_s19 + $0xa10] sm:$0xff] %v1297_v10  ;;  %1682 = vst [vmem:[%s2253_s19 + $0xa18] sm:$0xff] %v1298_v11  ;;  %v1300_v19 = vsub.f32 %v532_v14, %v916_v16  ;;  %v1301_v20 = vsub.f32 %v533_v17, %v917_v18  ;;  %v534_v21 = vld [vmem:[%s2238_s29 + $0xa38] sm:$0xff]  ;;  %v535_v23 = vld [vmem:[%s2238_s29 + $0xa40] sm:$0xff] }
 0x14c   : > { %v918_v22 = vld [vmem:[%s2231_s17 + $0xa38] sm:$0xff]  ;;  %v919_v25 = vld [vmem:[%s2231_s17 + $0xa40] sm:$0xff]  ;;  %v536_v26 = vld [vmem:[%s2238_s29 + $0xa48] sm:$0xff] }
 0x14d   : > { %1683 = vst [vmem:[%s2253_s19 + $0xa20] sm:$0xff] %v1299_v15  ;;  %v1302_v24 = vsub.f32 %v534_v21, %v918_v22  ;;  %v920_v27 = vld [vmem:[%s2231_s17 + $0xa48] sm:$0xff]  ;;  %1684 = vst [vmem:[%s2253_s19 + $0xa28] sm:$0xff] %v1300_v19  ;;  %v1303_v28 = vsub.f32 %v535_v23, %v919_v25  ;;  %v537_v30 = vld [vmem:[%s2238_s29 + $0xa50] sm:$0xff] }
 0x14e   : > { %1685 = vst [vmem:[%s2253_s19 + $0xa30] sm:$0xff] %v1301_v20  ;;  %v1304_v29 = vsub.f32 %v536_v26, %v920_v27  ;;  %v921_v31 = vld [vmem:[%s2231_s17 + $0xa50] sm:$0xff]  ;;  %v538_v32 = vld [vmem:[%s2238_s29 + $0xa58] sm:$0xff]  ;;  %v539_v35 = vld [vmem:[%s2238_s29 + $0xa60] sm:$0xff] }
 0x14f   : > { %1686 = vst [vmem:[%s2253_s19 + $0xa38] sm:$0xff] %v1302_v24  ;;  %v1305_v33 = vsub.f32 %v537_v30, %v921_v31  ;;  %v922_v34 = vld [vmem:[%s2231_s17 + $0xa58] sm:$0xff]  ;;  %v923_v36 = vld [vmem:[%s2231_s17 + $0xa60] sm:$0xff]  ;;  %1687 = vst [vmem:[%s2253_s19 + $0xa40] sm:$0xff] %v1303_v28 }
 0x150   : > { %1688 = vst [vmem:[%s2253_s19 + $0xa48] sm:$0xff] %v1304_v29  ;;  %v1306_v37 = vsub.f32 %v538_v32, %v922_v34  ;;  %v1307_v38 = vsub.f32 %v539_v35, %v923_v36  ;;  %v540_v39 = vld [vmem:[%s2238_s29 + $0xa68] sm:$0xff]  ;;  %v541_v41 = vld [vmem:[%s2238_s29 + $0xa70] sm:$0xff]  ;;  %v542_v44 = vld [vmem:[%s2238_s29 + $0xa78] sm:$0xff] }
 0x151   : > { %v924_v40 = vld [vmem:[%s2231_s17 + $0xa68] sm:$0xff]  ;;  %1689 = vst [vmem:[%s2253_s19 + $0xa50] sm:$0xff] %v1305_v33  ;;  %v925_v43 = vld [vmem:[%s2231_s17 + $0xa70] sm:$0xff]  ;;  %v926_v45 = vld [vmem:[%s2231_s17 + $0xa78] sm:$0xff] }
 0x152   : > { %v1308_v42 = vsub.f32 %v540_v39, %v924_v40  ;;  %1690 = vst [vmem:[%s2253_s19 + $0xa58] sm:$0xff] %v1306_v37  ;;  %1691 = vst [vmem:[%s2253_s19 + $0xa60] sm:$0xff] %v1307_v38  ;;  %v1309_v46 = vsub.f32 %v541_v41, %v925_v43  ;;  %v1310_v47 = vsub.f32 %v542_v44, %v926_v45  ;;  %v543_v48 = vld [vmem:[%s2238_s29 + $0xa80] sm:$0xff]  ;;  %v544_v50 = vld [vmem:[%s2238_s29 + $0xa88] sm:$0xff] }
 0x153   : > { %v927_v49 = vld [vmem:[%s2231_s17 + $0xa80] sm:$0xff]  ;;  %v928_v52 = vld [vmem:[%s2231_s17 + $0xa88] sm:$0xff]  ;;  %v545_v53 = vld [vmem:[%s2238_s29 + $0xa90] sm:$0xff] }
 0x154   : > { %1692 = vst [vmem:[%s2253_s19 + $0xa68] sm:$0xff] %v1308_v42  ;;  %v1311_v51 = vsub.f32 %v543_v48, %v927_v49  ;;  %v929_v54 = vld [vmem:[%s2231_s17 + $0xa90] sm:$0xff]  ;;  %1693 = vst [vmem:[%s2253_s19 + $0xa70] sm:$0xff] %v1309_v46  ;;  %v1312_v55 = vsub.f32 %v544_v50, %v928_v52  ;;  %v546_v57 = vld [vmem:[%s2238_s29 + $0xa98] sm:$0xff] }
 0x155   : > { %1694 = vst [vmem:[%s2253_s19 + $0xa78] sm:$0xff] %v1310_v47  ;;  %v1313_v56 = vsub.f32 %v545_v53, %v929_v54  ;;  %v930_v58 = vld [vmem:[%s2231_s17 + $0xa98] sm:$0xff]  ;;  %v547_v59 = vld [vmem:[%s2238_s29 + $0xaa0] sm:$0xff]  ;;  %v548_v62 = vld [vmem:[%s2238_s29 + $0xaa8] sm:$0xff] }
 0x156   : > { %1695 = vst [vmem:[%s2253_s19 + $0xa80] sm:$0xff] %v1311_v51  ;;  %v1314_v60 = vsub.f32 %v546_v57, %v930_v58  ;;  %v931_v61 = vld [vmem:[%s2231_s17 + $0xaa0] sm:$0xff]  ;;  %v932_v63 = vld [vmem:[%s2231_s17 + $0xaa8] sm:$0xff]  ;;  %1696 = vst [vmem:[%s2253_s19 + $0xa88] sm:$0xff] %v1312_v55 }
 0x157   : > { %1697 = vst [vmem:[%s2253_s19 + $0xa90] sm:$0xff] %v1313_v56  ;;  %v1315_v0 = vsub.f32 %v547_v59, %v931_v61  ;;  %v1316_v1 = vsub.f32 %v548_v62, %v932_v63  ;;  %v549_v2 = vld [vmem:[%s2238_s29 + $0xab0] sm:$0xff]  ;;  %v550_v4 = vld [vmem:[%s2238_s29 + $0xab8] sm:$0xff]  ;;  %v551_v7 = vld [vmem:[%s2238_s29 + $0xac0] sm:$0xff] }
 0x158   : > { %v933_v3 = vld [vmem:[%s2231_s17 + $0xab0] sm:$0xff]  ;;  %1698 = vst [vmem:[%s2253_s19 + $0xa98] sm:$0xff] %v1314_v60  ;;  %v934_v6 = vld [vmem:[%s2231_s17 + $0xab8] sm:$0xff]  ;;  %v935_v8 = vld [vmem:[%s2231_s17 + $0xac0] sm:$0xff] }
 0x159   : > { %v1317_v5 = vsub.f32 %v549_v2, %v933_v3  ;;  %1699 = vst [vmem:[%s2253_s19 + $0xaa0] sm:$0xff] %v1315_v0  ;;  %1700 = vst [vmem:[%s2253_s19 + $0xaa8] sm:$0xff] %v1316_v1  ;;  %v1318_v9 = vsub.f32 %v550_v4, %v934_v6  ;;  %v1319_v10 = vsub.f32 %v551_v7, %v935_v8  ;;  %v552_v11 = vld [vmem:[%s2238_s29 + $0xac8] sm:$0xff]  ;;  %v553_v13 = vld [vmem:[%s2238_s29 + $0xad0] sm:$0xff] }
 0x15a   : > { %v936_v12 = vld [vmem:[%s2231_s17 + $0xac8] sm:$0xff]  ;;  %v937_v15 = vld [vmem:[%s2231_s17 + $0xad0] sm:$0xff]  ;;  %v554_v16 = vld [vmem:[%s2238_s29 + $0xad8] sm:$0xff] }
 0x15b   : > { %1701 = vst [vmem:[%s2253_s19 + $0xab0] sm:$0xff] %v1317_v5  ;;  %v1320_v14 = vsub.f32 %v552_v11, %v936_v12  ;;  %v938_v17 = vld [vmem:[%s2231_s17 + $0xad8] sm:$0xff]  ;;  %1702 = vst [vmem:[%s2253_s19 + $0xab8] sm:$0xff] %v1318_v9  ;;  %v1321_v18 = vsub.f32 %v553_v13, %v937_v15  ;;  %v555_v20 = vld [vmem:[%s2238_s29 + $0xae0] sm:$0xff] }
 0x15c   : > { %1703 = vst [vmem:[%s2253_s19 + $0xac0] sm:$0xff] %v1319_v10  ;;  %v1322_v19 = vsub.f32 %v554_v16, %v938_v17  ;;  %v939_v21 = vld [vmem:[%s2231_s17 + $0xae0] sm:$0xff]  ;;  %v556_v22 = vld [vmem:[%s2238_s29 + $0xae8] sm:$0xff]  ;;  %v557_v25 = vld [vmem:[%s2238_s29 + $0xaf0] sm:$0xff] }
 0x15d   : > { %1704 = vst [vmem:[%s2253_s19 + $0xac8] sm:$0xff] %v1320_v14  ;;  %v1323_v23 = vsub.f32 %v555_v20, %v939_v21  ;;  %v940_v24 = vld [vmem:[%s2231_s17 + $0xae8] sm:$0xff]  ;;  %v941_v26 = vld [vmem:[%s2231_s17 + $0xaf0] sm:$0xff]  ;;  %1705 = vst [vmem:[%s2253_s19 + $0xad0] sm:$0xff] %v1321_v18 }
 0x15e   : > { %1706 = vst [vmem:[%s2253_s19 + $0xad8] sm:$0xff] %v1322_v19  ;;  %v1324_v27 = vsub.f32 %v556_v22, %v940_v24  ;;  %v1325_v28 = vsub.f32 %v557_v25, %v941_v26  ;;  %v558_v29 = vld [vmem:[%s2238_s29 + $0xaf8] sm:$0xff]  ;;  %v559_v31 = vld [vmem:[%s2238_s29 + $0xb00] sm:$0xff]  ;;  %v560_v34 = vld [vmem:[%s2238_s29 + $0xb08] sm:$0xff] }
 0x15f   : > { %v942_v30 = vld [vmem:[%s2231_s17 + $0xaf8] sm:$0xff]  ;;  %1707 = vst [vmem:[%s2253_s19 + $0xae0] sm:$0xff] %v1323_v23  ;;  %v943_v33 = vld [vmem:[%s2231_s17 + $0xb00] sm:$0xff]  ;;  %v944_v35 = vld [vmem:[%s2231_s17 + $0xb08] sm:$0xff] }
 0x160   : > { %v1326_v32 = vsub.f32 %v558_v29, %v942_v30  ;;  %1708 = vst [vmem:[%s2253_s19 + $0xae8] sm:$0xff] %v1324_v27  ;;  %1709 = vst [vmem:[%s2253_s19 + $0xaf0] sm:$0xff] %v1325_v28  ;;  %v1327_v36 = vsub.f32 %v559_v31, %v943_v33  ;;  %v1328_v37 = vsub.f32 %v560_v34, %v944_v35  ;;  %v561_v38 = vld [vmem:[%s2238_s29 + $0xb10] sm:$0xff]  ;;  %v562_v40 = vld [vmem:[%s2238_s29 + $0xb18] sm:$0xff] }
 0x161   : > { %v945_v39 = vld [vmem:[%s2231_s17 + $0xb10] sm:$0xff]  ;;  %v946_v42 = vld [vmem:[%s2231_s17 + $0xb18] sm:$0xff]  ;;  %v563_v43 = vld [vmem:[%s2238_s29 + $0xb20] sm:$0xff] }
 0x162   : > { %1710 = vst [vmem:[%s2253_s19 + $0xaf8] sm:$0xff] %v1326_v32  ;;  %v1329_v41 = vsub.f32 %v561_v38, %v945_v39  ;;  %v947_v44 = vld [vmem:[%s2231_s17 + $0xb20] sm:$0xff]  ;;  %1711 = vst [vmem:[%s2253_s19 + $0xb00] sm:$0xff] %v1327_v36  ;;  %v1330_v45 = vsub.f32 %v562_v40, %v946_v42  ;;  %v564_v47 = vld [vmem:[%s2238_s29 + $0xb28] sm:$0xff] }
 0x163   : > { %1712 = vst [vmem:[%s2253_s19 + $0xb08] sm:$0xff] %v1328_v37  ;;  %v1331_v46 = vsub.f32 %v563_v43, %v947_v44  ;;  %v948_v48 = vld [vmem:[%s2231_s17 + $0xb28] sm:$0xff]  ;;  %v565_v49 = vld [vmem:[%s2238_s29 + $0xb30] sm:$0xff]  ;;  %v566_v52 = vld [vmem:[%s2238_s29 + $0xb38] sm:$0xff] }
 0x164   : > { %1713 = vst [vmem:[%s2253_s19 + $0xb10] sm:$0xff] %v1329_v41  ;;  %v1332_v50 = vsub.f32 %v564_v47, %v948_v48  ;;  %v949_v51 = vld [vmem:[%s2231_s17 + $0xb30] sm:$0xff]  ;;  %v950_v53 = vld [vmem:[%s2231_s17 + $0xb38] sm:$0xff]  ;;  %1714 = vst [vmem:[%s2253_s19 + $0xb18] sm:$0xff] %v1330_v45 }
 0x165   : > { %1715 = vst [vmem:[%s2253_s19 + $0xb20] sm:$0xff] %v1331_v46  ;;  %v1333_v54 = vsub.f32 %v565_v49, %v949_v51  ;;  %v1334_v55 = vsub.f32 %v566_v52, %v950_v53  ;;  %v567_v56 = vld [vmem:[%s2238_s29 + $0xb40] sm:$0xff]  ;;  %v568_v58 = vld [vmem:[%s2238_s29 + $0xb48] sm:$0xff]  ;;  %v569_v61 = vld [vmem:[%s2238_s29 + $0xb50] sm:$0xff] }
 0x166   : > { %v951_v57 = vld [vmem:[%s2231_s17 + $0xb40] sm:$0xff]  ;;  %1716 = vst [vmem:[%s2253_s19 + $0xb28] sm:$0xff] %v1332_v50  ;;  %v952_v60 = vld [vmem:[%s2231_s17 + $0xb48] sm:$0xff]  ;;  %v953_v62 = vld [vmem:[%s2231_s17 + $0xb50] sm:$0xff] }
 0x167   : > { %v1335_v59 = vsub.f32 %v567_v56, %v951_v57  ;;  %1717 = vst [vmem:[%s2253_s19 + $0xb30] sm:$0xff] %v1333_v54  ;;  %1718 = vst [vmem:[%s2253_s19 + $0xb38] sm:$0xff] %v1334_v55  ;;  %v1336_v63 = vsub.f32 %v568_v58, %v952_v60  ;;  %v1337_v0 = vsub.f32 %v569_v61, %v953_v62  ;;  %v570_v1 = vld [vmem:[%s2238_s29 + $0xb58] sm:$0xff]  ;;  %v571_v3 = vld [vmem:[%s2238_s29 + $0xb60] sm:$0xff] }
 0x168   : > { %v954_v2 = vld [vmem:[%s2231_s17 + $0xb58] sm:$0xff]  ;;  %v955_v5 = vld [vmem:[%s2231_s17 + $0xb60] sm:$0xff]  ;;  %v572_v6 = vld [vmem:[%s2238_s29 + $0xb68] sm:$0xff] }
 0x169   : > { %1719 = vst [vmem:[%s2253_s19 + $0xb40] sm:$0xff] %v1335_v59  ;;  %v1338_v4 = vsub.f32 %v570_v1, %v954_v2  ;;  %v956_v7 = vld [vmem:[%s2231_s17 + $0xb68] sm:$0xff]  ;;  %1720 = vst [vmem:[%s2253_s19 + $0xb48] sm:$0xff] %v1336_v63  ;;  %v1339_v8 = vsub.f32 %v571_v3, %v955_v5  ;;  %v573_v10 = vld [vmem:[%s2238_s29 + $0xb70] sm:$0xff] }
 0x16a   : > { %1721 = vst [vmem:[%s2253_s19 + $0xb50] sm:$0xff] %v1337_v0  ;;  %v1340_v9 = vsub.f32 %v572_v6, %v956_v7  ;;  %v957_v11 = vld [vmem:[%s2231_s17 + $0xb70] sm:$0xff]  ;;  %v574_v12 = vld [vmem:[%s2238_s29 + $0xb78] sm:$0xff]  ;;  %v575_v15 = vld [vmem:[%s2238_s29 + $0xb80] sm:$0xff] }
 0x16b   : > { %1722 = vst [vmem:[%s2253_s19 + $0xb58] sm:$0xff] %v1338_v4  ;;  %v1341_v13 = vsub.f32 %v573_v10, %v957_v11  ;;  %v958_v14 = vld [vmem:[%s2231_s17 + $0xb78] sm:$0xff]  ;;  %v959_v16 = vld [vmem:[%s2231_s17 + $0xb80] sm:$0xff]  ;;  %1723 = vst [vmem:[%s2253_s19 + $0xb60] sm:$0xff] %v1339_v8 }
 0x16c   : > { %1724 = vst [vmem:[%s2253_s19 + $0xb68] sm:$0xff] %v1340_v9  ;;  %v1342_v17 = vsub.f32 %v574_v12, %v958_v14  ;;  %v1343_v18 = vsub.f32 %v575_v15, %v959_v16  ;;  %v576_v19 = vld [vmem:[%s2238_s29 + $0xb88] sm:$0xff]  ;;  %v577_v21 = vld [vmem:[%s2238_s29 + $0xb90] sm:$0xff]  ;;  %v578_v24 = vld [vmem:[%s2238_s29 + $0xb98] sm:$0xff] }
 0x16d   : > { %v960_v20 = vld [vmem:[%s2231_s17 + $0xb88] sm:$0xff]  ;;  %1725 = vst [vmem:[%s2253_s19 + $0xb70] sm:$0xff] %v1341_v13  ;;  %v961_v23 = vld [vmem:[%s2231_s17 + $0xb90] sm:$0xff]  ;;  %v962_v25 = vld [vmem:[%s2231_s17 + $0xb98] sm:$0xff] }
 0x16e   : > { %v1344_v22 = vsub.f32 %v576_v19, %v960_v20  ;;  %1726 = vst [vmem:[%s2253_s19 + $0xb78] sm:$0xff] %v1342_v17  ;;  %1727 = vst [vmem:[%s2253_s19 + $0xb80] sm:$0xff] %v1343_v18  ;;  %v1345_v26 = vsub.f32 %v577_v21, %v961_v23  ;;  %v1346_v27 = vsub.f32 %v578_v24, %v962_v25  ;;  %v579_v28 = vld [vmem:[%s2238_s29 + $0xba0] sm:$0xff]  ;;  %v580_v30 = vld [vmem:[%s2238_s29 + $0xba8] sm:$0xff] }
 0x16f   : > { %v963_v29 = vld [vmem:[%s2231_s17 + $0xba0] sm:$0xff]  ;;  %v964_v32 = vld [vmem:[%s2231_s17 + $0xba8] sm:$0xff]  ;;  %v581_v33 = vld [vmem:[%s2238_s29 + $0xbb0] sm:$0xff] }
 0x170   : > { %1728 = vst [vmem:[%s2253_s19 + $0xb88] sm:$0xff] %v1344_v22  ;;  %v1347_v31 = vsub.f32 %v579_v28, %v963_v29  ;;  %v965_v34 = vld [vmem:[%s2231_s17 + $0xbb0] sm:$0xff]  ;;  %1729 = vst [vmem:[%s2253_s19 + $0xb90] sm:$0xff] %v1345_v26  ;;  %v1348_v35 = vsub.f32 %v580_v30, %v964_v32  ;;  %v582_v37 = vld [vmem:[%s2238_s29 + $0xbb8] sm:$0xff] }
 0x171   : > { %1730 = vst [vmem:[%s2253_s19 + $0xb98] sm:$0xff] %v1346_v27  ;;  %v1349_v36 = vsub.f32 %v581_v33, %v965_v34  ;;  %v966_v38 = vld [vmem:[%s2231_s17 + $0xbb8] sm:$0xff]  ;;  %v583_v39 = vld [vmem:[%s2238_s29 + $0xbc0] sm:$0xff]  ;;  %v584_v42 = vld [vmem:[%s2238_s29 + $0xbc8] sm:$0xff] }
 0x172   : > { %1731 = vst [vmem:[%s2253_s19 + $0xba0] sm:$0xff] %v1347_v31  ;;  %v1350_v40 = vsub.f32 %v582_v37, %v966_v38  ;;  %v967_v41 = vld [vmem:[%s2231_s17 + $0xbc0] sm:$0xff]  ;;  %v968_v43 = vld [vmem:[%s2231_s17 + $0xbc8] sm:$0xff]  ;;  %1732 = vst [vmem:[%s2253_s19 + $0xba8] sm:$0xff] %v1348_v35 }
 0x173   : > { %1733 = vst [vmem:[%s2253_s19 + $0xbb0] sm:$0xff] %v1349_v36  ;;  %v1351_v44 = vsub.f32 %v583_v39, %v967_v41  ;;  %v1352_v45 = vsub.f32 %v584_v42, %v968_v43  ;;  %v585_v46 = vld [vmem:[%s2238_s29 + $0xbd0] sm:$0xff]  ;;  %v586_v48 = vld [vmem:[%s2238_s29 + $0xbd8] sm:$0xff]  ;;  %v587_v51 = vld [vmem:[%s2238_s29 + $0xbe0] sm:$0xff] }
 0x174   : > { %v969_v47 = vld [vmem:[%s2231_s17 + $0xbd0] sm:$0xff]  ;;  %1734 = vst [vmem:[%s2253_s19 + $0xbb8] sm:$0xff] %v1350_v40  ;;  %v970_v50 = vld [vmem:[%s2231_s17 + $0xbd8] sm:$0xff]  ;;  %v971_v52 = vld [vmem:[%s2231_s17 + $0xbe0] sm:$0xff] }
 0x175   : > { %v1353_v49 = vsub.f32 %v585_v46, %v969_v47  ;;  %1735 = vst [vmem:[%s2253_s19 + $0xbc0] sm:$0xff] %v1351_v44  ;;  %1736 = vst [vmem:[%s2253_s19 + $0xbc8] sm:$0xff] %v1352_v45  ;;  %v1354_v53 = vsub.f32 %v586_v48, %v970_v50  ;;  %v1355_v54 = vsub.f32 %v587_v51, %v971_v52  ;;  %v588_v55 = vld [vmem:[%s2238_s29 + $0xbe8] sm:$0xff]  ;;  %v589_v57 = vld [vmem:[%s2238_s29 + $0xbf0] sm:$0xff] }
 0x176   : > { %v972_v56 = vld [vmem:[%s2231_s17 + $0xbe8] sm:$0xff]  ;;  %v973_v59 = vld [vmem:[%s2231_s17 + $0xbf0] sm:$0xff]  ;;  %v590_v60 = vld [vmem:[%s2238_s29 + $0xbf8] sm:$0xff] }
 0x177   : > { %1737 = vst [vmem:[%s2253_s19 + $0xbd0] sm:$0xff] %v1353_v49  ;;  %v1356_v58 = vsub.f32 %v588_v55, %v972_v56  ;;  %v974_v61 = vld [vmem:[%s2231_s17 + $0xbf8] sm:$0xff]  ;;  %1738 = vst [vmem:[%s2253_s19 + $0xbd8] sm:$0xff] %v1354_v53  ;;  %v1357_v62 = vsub.f32 %v589_v57, %v973_v59 }
 0x178   : > { %1739 = vst [vmem:[%s2253_s19 + $0xbe0] sm:$0xff] %v1355_v54  ;;  %v1358_v63 = vsub.f32 %v590_v60, %v974_v61 }
 0x179   : > { %1740 = vst [vmem:[%s2253_s19 + $0xbe8] sm:$0xff] %v1356_v58  ;;  %1741 = vst [vmem:[%s2253_s19 + $0xbf0] sm:$0xff] %v1357_v62 }
 0x17a   : > { %1742 = vst [vmem:[%s2253_s19 + $0xbf8] sm:$0xff] %v1358_v63 }
 0x17b   : > { %1999 = shalt.err (!%p1996_p3)
}
 0x17c   : > { %s2000_s24 = scalar_lea.hbm %s3398_s16, 49152  ;;  %s2004_s30 = scalar_lea.hbm %s3449_s2, 147456 }
 0x17d   : > { %p2001_p10 = scmp.ne.s32.totalorder %s3398_s16, %s2000_s24  ;;  %p2005_p5 = scmp.lt.s32.totalorder %s3398_s16, %s3449_s2 }
 0x17e   : > { %p2006_p8 = scmp.lt.s32.totalorder %s2004_s30, %s2000_s24 }
 0x17f   : > { %p2002_p11 = pnand %p2001_p10, %p3458_p0 }
 0x180   : > { %p2007_p6 = por %p2006_p8, %p2005_p5 }
 0x181   : > { %p2003_p4 = pneg %p2002_p11 }
 0x183   : > { %p2008_p12 = pnand %p2007_p6, %p2003_p4 }
 0x185   : > { %2011 = shalt.err (!%p2008_p12)
}
 0x186   : > { %s2061_s28 = smov 384   ;;  %s2062_s29 = smov 24  }
 0x187   : > { %1879 = dma.vmem_to_hbm [thread:$0]  (%p3458_p0), %s3400_s5, 49152, %s3398_s16, %s1744_s27, %s2061_s28, %s2061_s28, %s2062_s29  }
 0x188 PF: > { %p1893_p2 = scmp.ge.s32.totalorder %s2054_s12, 2  ;;  %s1773_s19 = sand.u32 1, %s2042_s9  }
 0x189   : > { %p3459_p7 = scmp.ne.s32.totalorder %s3454_s21, 0  ;;  %s1774_s4 = scalar_lea.sflag [#allocation4], %s1773_s19 }
 0x18b   : > { %p1889_p9 = pnand %p1893_p2, %p3459_p7 }
 0x18d   : > { %p1890_p13 = pneg %p1889_p9 }
 0x18f   : > { %2037 = dma.done.wait (%p1890_p13), %s1774_s4, 49152  }
 0x190   : > { %2039 = vsyncadd (%p1890_p13), %s1774_s4, 4294918144  ;;  %p18_p1 = scmp.ge.s32.totalorder %s2103_s15, 5   ;;  %s3460_s9 = smov %s2046_s10 }
 0x191   : > { %s3461_s10 = smov %s2050_s11  ;;  %s3462_s11 = smov %s2115_s18 }
 0x192   : > { %s3463_s12 = smov %s2103_s15  ;;  %20 = sbr.rel (!%p18_p1) target bundleno = 7 (0x7), region = 86 }
 0x197   :  { %1779 = vsyncpa [#allocation3], 1 }
 0x198   :  { %1781 = vsyncpa [#allocation3 + $0x1], 1 }
 0x199   :  { %1782 = vsyncpa [#allocation6], 1 }
 0x19a   :  { %1784 = vsyncpa [#allocation6 + $0x1], 1 }
 0x19b   :  { %1785 = vsyncpa [#allocation4], 1 }
 0x19c   :  { %1787 = vsyncpa [#allocation4 + $0x1], 1 }

</bundles_post_ra>
